<compile_context>
chip_gen: v6e
topology: v6e:2x2x1
jax: 0.10.0
libtpu: 0.0.40
codegen_flags: <defaults>
</compile_context>

<pallas_src>
import jax
import jax.numpy as jnp
from jax import lax
from jax.experimental import pallas as pl
from jax.experimental.pallas import tpu as pltpu

_VMEM_LIMIT = 32 * 1024 * 1024          # safe scoped-VMEM budget on v5e..v7x
_SQRT_2_OVER_PI = 0.7978845608028654


def _gelu(x):
    # tanh-GELU: one EUP tanh instead of a ~15-op VPU erf-polynomial chain.
    return 0.5 * x * (1.0 + jnp.tanh(_SQRT_2_OVER_PI * (x + 0.044715 * (x * x * x))))


# ----------------------------- kernel bodies --------------------------------


def _conv_stats_kernel(p_ref, w_ref, y_ref, sum_ref, ssq_ref):
    """3x3 conv as ONE matmul (taps folded into K) + per-tile BN partial stats."""
    y = jnp.dot(p_ref[...], w_ref[...], preferred_element_type=jnp.float32)
    y_ref[...] = y
    sum_ref[...] = jnp.sum(y, axis=0, keepdims=True)[None]       # (1, 1, C)
    ssq_ref[...] = jnp.sum(y * y, axis=0, keepdims=True)[None]   # (1, 1, C)


def _bn_gelu_kernel(y_ref, scale_ref, shift_ref, o_ref):
    """BatchNorm affine (single FMA) + tanh-GELU."""
    z = y_ref[...] * scale_ref[...] + shift_ref[...]
    o_ref[...] = _gelu(z).astype(o_ref.dtype)


def _bn_gelu_pool_kernel(y_ref, scale_ref, shift_ref, o_ref, g_scr, gw_scr):
    """BN affine + tanh-GELU + 2x2 MaxPool via two strided row maxes."""
    th, w, _ = g_scr.shape
    wo = w // 2
    z = y_ref[0] * scale_ref[...] + shift_ref[...]               # (th, W, C)
    g_scr[...] = _gelu(z)                    # GELU first: GELU is not monotonic
    gw_scr[...] = jnp.maximum(g_scr[:, pl.ds(0, wo, 2), :],      # pool over W
                              g_scr[:, pl.ds(1, wo, 2), :])
    o_ref[0] = jnp.maximum(gw_scr[pl.ds(0, th // 2, 2), :, :],   # pool over H
                           gw_scr[pl.ds(1, th // 2, 2), :, :])


# ----------------------------- pallas_call wrappers --------------------------


def _conv_stats(patches, w_mat, *, tile_m):
    m, k = patches.shape
    cout = w_mat.shape[1]
    nt = m // tile_m
    return pl.pallas_call(
        _conv_stats_kernel,
        out_shape=(
            jax.ShapeDtypeStruct((m, cout), jnp.float32),      # pre-BN conv output
            jax.ShapeDtypeStruct((nt, 1, cout), jnp.float32),  # per-tile sum
            jax.ShapeDtypeStruct((nt, 1, cout), jnp.float32),  # per-tile sum of squares
        ),
        grid_spec=pltpu.PrefetchScalarGridSpec(
            num_scalar_prefetch=0,
            grid=(nt,),
            in_specs=[
                pl.BlockSpec((tile_m, k), lambda i: (i, 0)),
                pl.BlockSpec((k, cout), lambda i: (0, 0)),
            ],
            out_specs=[
                pl.BlockSpec((tile_m, cout), lambda i: (i, 0)),
                pl.BlockSpec((1, 1, cout), lambda i: (i, 0, 0)),
                pl.BlockSpec((1, 1, cout), lambda i: (i, 0, 0)),
            ],
        ),
        compiler_params=pltpu.CompilerParams(
            dimension_semantics=("parallel",),
            vmem_limit_bytes=_VMEM_LIMIT,
        ),
    )(patches, w_mat)


def _bn_gelu(y, scale, shift, *, tile_m, out_dtype=jnp.bfloat16):
    m, c = y.shape
    nt = m // tile_m
    return pl.pallas_call(
        _bn_gelu_kernel,
        out_shape=jax.ShapeDtypeStruct((m, c), out_dtype),
        grid_spec=pltpu.PrefetchScalarGridSpec(
            num_scalar_prefetch=0,
            grid=(nt,),
            in_specs=[
                pl.BlockSpec((tile_m, c), lambda i: (i, 0)),
                pl.BlockSpec((1, c), lambda i: (0, 0)),
                pl.BlockSpec((1, c), lambda i: (0, 0)),
            ],
            out_specs=pl.BlockSpec((tile_m, c), lambda i: (i, 0)),
        ),
        compiler_params=pltpu.CompilerParams(
            dimension_semantics=("parallel",),
            vmem_limit_bytes=_VMEM_LIMIT,
        ),
    )(y, scale, shift)


def _bn_gelu_pool(y_nhwc, scale, shift, *, tile_h):
    n, h, w, c = y_nhwc.shape
    ho, wo = h // 2, w // 2
    return pl.pallas_call(
        _bn_gelu_pool_kernel,
        out_shape=jax.ShapeDtypeStruct((n, ho, wo, c), jnp.float32),
        grid_spec=pltpu.PrefetchScalarGridSpec(
            num_scalar_prefetch=0,
            grid=(n, h // tile_h),
            in_specs=[
                pl.BlockSpec((1, tile_h, w, c), lambda b, i: (b, i, 0, 0)),
                pl.BlockSpec((1, c), lambda b, i: (0, 0)),
                pl.BlockSpec((1, c), lambda b, i: (0, 0)),
            ],
            out_specs=pl.BlockSpec((1, tile_h // 2, wo, c),
                                   lambda b, i: (b, i, 0, 0)),
            scratch_shapes=[
                pltpu.VMEM((tile_h, w, c), jnp.float32),
                pltpu.VMEM((tile_h, wo, c), jnp.float32),
            ],
        ),
        compiler_params=pltpu.CompilerParams(
            dimension_semantics=("parallel", "parallel"),
            vmem_limit_bytes=_VMEM_LIMIT,
        ),
    )(y_nhwc, scale, shift)


# ----------------------------- host-side glue --------------------------------


def _finish_stats(tile_sums, tile_ssqs, m, gamma, beta, eps=1e-5):
    """Finish training-mode BN from per-tile partials; fold affine into one FMA."""
    s = jnp.sum(tile_sums, axis=(0, 1))
    ss = jnp.sum(tile_ssqs, axis=(0, 1))
    mean = s / m
    var = ss / m - mean * mean              # biased batch variance (PyTorch BN train)
    scale = gamma[0] * lax.rsqrt(var + eps)
    shift = beta[0] - mean * scale
    return scale[None, :], shift[None, :]   # (1, C) f32 each


def _im2col(x_nhwc):
    """(N,H,W,C) -> (N*H*W, 9*C) 3x3 SAME (pad=1) patches, K ordered (dy,dx,c)."""
    n, h, w, c = x_nhwc.shape
    xp = jnp.pad(x_nhwc, ((0, 0), (1, 1), (1, 1), (0, 0)))
    taps = [xp[:, dy:dy + h, dx:dx + w, :] for dy in range(3) for dx in range(3)]
    return jnp.stack(taps, axis=3).reshape(n * h * w, 9 * c)


def _largest_divisor(n, cap, multiple):
    cap = min(cap, n)
    for d in range(cap, 0, -1):
        if n % d == 0 and d % multiple == 0:
            return d
    return n


def _pick_tile_h(h, w, c, budget_bytes=2 << 20):
    cap = max(2, min(h, budget_bytes // max(1, w * c * 4)))
    for d in range(cap - (cap % 2), 1, -2):
        if h % d == 0:
            return d
    return 2


def unet_down(x_nchw, params):
    """UnetDown forward: ResidualConvBlock(is_res=False) then MaxPool2d(2)."""
    w1, _b1, g1, be1, w2, _b2, g2, be2 = params  # conv biases cancel under BN(train)
    n, cin, h, w = x_nchw.shape
    assert h % 2 == 0 and w % 2 == 0, "MaxPool2d(2) path assumes even H, W"
    cout = w1.shape[-1]
    m = n * h * w
    tile_m = _largest_divisor(m, 256, 8)   # sweep 512-2048 at production sizes

    # NCHW -> NHWC; bf16 only at the MXU inputs (elementwise math stays f32).
    x = jnp.transpose(x_nchw, (0, 2, 3, 1)).astype(jnp.bfloat16)

    # ---- block 1: conv3x3 -> BN(train) -> GELU ----
    p1 = _im2col(x)                                            # (M, 9*Cin) bf16
    w1m = w1.reshape(9 * cin, cout).astype(jnp.bfloat16)
    y1, s1, q1 = _conv_stats(p1, w1m, tile_m=tile_m)
    scale1, shift1 = _finish_stats(s1, q1, m, g1, be1)
    h1 = _bn_gelu(y1, scale1, shift1, tile_m=tile_m)           # (M, Cout) bf16

    # ---- block 2: conv3x3 -> BN(train) -> GELU -> MaxPool2d(2) ----
    p2 = _im2col(h1.reshape(n, h, w, cout))                    # (M, 9*Cout) bf16
    w2m = w2.reshape(9 * cout, cout).astype(jnp.bfloat16)
    y2, s2, q2 = _conv_stats(p2, w2m, tile_m=tile_m)
    scale2, shift2 = _finish_stats(s2, q2, m, g2, be2)
    th = _pick_tile_h(h, w, cout)
    out = _bn_gelu_pool(y2.reshape(n, h, w, cout), scale2, shift2, tile_h=th)
    return jnp.transpose(out, (0, 3, 1, 2))                    # NHWC -> NCHW


# ----------------------------- params & reference ----------------------------


def init_params(key, cin, cout):
    # Deterministic synthetic params. Conv weights in HWIO = (3,3,Cin,Cout)
    # (PyTorch's (Cout,Cin,3,3) transposed). BN affine uses PyTorch defaults.
    k1, k2, k3, k4 = jax.random.split(key, 4)
    w1 = 0.1 * jax.random.normal(k1, (3, 3, cin, cout), jnp.float32)
    b1 = 0.1 * jax.random.normal(k2, (1, cout), jnp.float32)
    w2 = 0.1 * jax.random.normal(k3, (3, 3, cout, cout), jnp.float32)
    b2 = 0.1 * jax.random.normal(k4, (1, cout), jnp.float32)
    g1 = jnp.ones((1, cout), jnp.float32)
    be1 = jnp.zeros((1, cout), jnp.float32)
    g2 = jnp.ones((1, cout), jnp.float32)
    be2 = jnp.zeros((1, cout), jnp.float32)
    return (w1, b1, g1, be1, w2, b2, g2, be2)


def ref_forward(x_nchw, params, *, matmul_dtype=jnp.float32, approx_gelu=False):
    """Pure-JAX reference mirroring the PyTorch module (training-mode BN).

    matmul_dtype=bf16 + approx_gelu=True reproduces the kernel's numerics
    (structural check); the f32/exact defaults match PyTorch exactly."""
    w1, b1, g1, be1, w2, b2, g2, be2 = params
    x = jnp.transpose(x_nchw, (0, 2, 3, 1)).astype(jnp.float32)

    def block(hmap, wgt, b, g, be):
        y = lax.conv_general_dilated(
            hmap.astype(matmul_dtype), wgt.astype(matmul_dtype), (1, 1), 'SAME',
            dimension_numbers=('NHWC', 'HWIO', 'NHWC'),
            preferred_element_type=jnp.float32,
            precision=lax.Precision.HIGHEST) + b
        mean = jnp.mean(y, axis=(0, 1, 2))
        var = jnp.mean((y - mean) ** 2, axis=(0, 1, 2))
        yn = (y - mean) * lax.rsqrt(var + 1e-5) * g[0] + be[0]
        return jax.nn.gelu(yn, approximate=approx_gelu)

    h1 = block(x, w1, b1, g1, be1)
    h2 = block(h1, w2, b2, g2, be2)
    n, hh, ww, c = h2.shape
    pooled = jnp.max(h2.reshape(n, hh // 2, 2, ww // 2, 2, c), axis=(2, 4))
    return jnp.transpose(pooled, (0, 3, 1, 2))


if __name__ == "__main__":
    key = jax.random.PRNGKey(0)
    kx, kp = jax.random.split(key)
    N, CIN, COUT, H, W = 2, 4, 8, 16, 16

    x = jax.random.normal(kx, (N, CIN, H, W), jnp.float32)
    params = init_params(kp, CIN, COUT)

    out = jax.block_until_ready(jax.jit(unet_down)(x, params))
    assert out.shape == (N, COUT, H // 2, W // 2), out.shape
    assert bool(jnp.all(jnp.isfinite(out)))

    # Structural check: reference run with the same bf16-matmul / tanh-GELU numerics.
    ref_matched = jax.block_until_ready(
        ref_forward(x, params, matmul_dtype=jnp.bfloat16, approx_gelu=True))
    err_matched = float(jnp.max(jnp.abs(out - ref_matched)))
    assert err_matched < 3e-3, f"matched-ref max abs err {err_matched}"

    # Envelope check vs the full-f32 exact-GELU (PyTorch-equivalent) reference;
    # the slack is the expected bf16-MXU + tanh-GELU quantization envelope.
    ref_f32 = jax.block_until_ready(ref_forward(x, params))
    err_f32 = float(jnp.max(jnp.abs(out - ref_f32)))
    assert err_f32 < 5e-2, f"f32-ref max abs err {err_f32}"

    print("KERNEL_OK")
</pallas_src>

<mosaic_0001>
module attributes {stable_mosaic.version = 11 : i64} {
  func.func @_conv_stats_kernel(%arg0: i32, %arg1: memref<256x36xbf16, #tpu.memory_space<vmem>>, %arg2: memref<36x8xbf16, #tpu.memory_space<vmem>>, %arg3: memref<256x8xf32, #tpu.memory_space<vmem>>, %arg4: memref<1x1x8xf32, #tpu.memory_space<vmem>>, %arg5: memref<1x1x8xf32, #tpu.memory_space<vmem>>) attributes {dimension_semantics = [#tpu.dimension_semantics<parallel>], iteration_bounds = array<i64: 2>, scalar_prefetch = 0 : i64, scratch_operands = 0 : i64, tpu.core_type = #tpu.core_type<tc>, window_params = [{transform_indices = @transform_0, window_bounds = array<i64: 256, 36>}, {pipeline_mode = #tpu.pipeline_mode<synchronous>, transform_indices = @transform_1, window_bounds = array<i64: 36, 8>}, {transform_indices = @transform_2, window_bounds = array<i64: 256, 8>}, {transform_indices = @transform_3, window_bounds = array<i64: 1, 1, 8>}, {transform_indices = @transform_4, window_bounds = array<i64: 1, 1, 8>}]} {
    %c0 = arith.constant 0 : index
    %c0_0 = arith.constant 0 : index
    %0 = vector.load %arg1[%c0, %c0_0] : memref<256x36xbf16, #tpu.memory_space<vmem>>, vector<256x36xbf16>
    %c0_1 = arith.constant 0 : index
    %c0_2 = arith.constant 0 : index
    %1 = vector.load %arg2[%c0_1, %c0_2] : memref<36x8xbf16, #tpu.memory_space<vmem>>, vector<36x8xbf16>
    %cst = arith.constant dense<0.000000e+00> : vector<256x8xf32>
    %2 = tpu.matmul %0, %1, %cst {dimension_numbers = #tpu.dot_dimension_numbers<[1], [0], [0], [1], [0, 0, 1, 1], [], []>} : vector<256x36xbf16>, vector<36x8xbf16>, vector<256x8xf32> -> vector<256x8xf32>
    %c0_3 = arith.constant 0 : index
    %c0_4 = arith.constant 0 : index
    %3 = vector.load %arg3[%c0_3, %c0_4] : memref<256x8xf32, #tpu.memory_space<vmem>>, vector<256x8xf32>
    tpu.vector_store %arg3[%c0_3, %c0_4], %2 {strides = array<i32>} : memref<256x8xf32, #tpu.memory_space<vmem>>, vector<256x8xf32>,
    %cst_5 = arith.constant dense<0.000000e+00> : vector<8xf32>
    %4 = vector.multi_reduction <add>, %2, %cst_5 [0] : vector<256x8xf32> to vector<8xf32>
    %5 = vector.shape_cast %4 : vector<8xf32> to vector<1x8xf32>
    %6 = vector.shape_cast %5 : vector<1x8xf32> to vector<1x1x8xf32>
    %c0_6 = arith.constant 0 : index
    %c0_7 = arith.constant 0 : index
    %c0_8 = arith.constant 0 : index
    %7 = vector.load %arg4[%c0_6, %c0_7, %c0_8] : memref<1x1x8xf32, #tpu.memory_space<vmem>>, vector<1x1x8xf32>
    tpu.vector_store %arg4[%c0_6, %c0_7, %c0_8], %6 {strides = array<i32>} : memref<1x1x8xf32, #tpu.memory_space<vmem>>, vector<1x1x8xf32>,
    %8 = arith.mulf %2, %2 : vector<256x8xf32>
    %cst_9 = arith.constant dense<0.000000e+00> : vector<8xf32>
    %9 = vector.multi_reduction <add>, %8, %cst_9 [0] : vector<256x8xf32> to vector<8xf32>
    %10 = vector.shape_cast %9 : vector<8xf32> to vector<1x8xf32>
    %11 = vector.shape_cast %10 : vector<1x8xf32> to vector<1x1x8xf32>
    %c0_10 = arith.constant 0 : index
    %c0_11 = arith.constant 0 : index
    %c0_12 = arith.constant 0 : index
    %12 = vector.load %arg5[%c0_10, %c0_11, %c0_12] : memref<1x1x8xf32, #tpu.memory_space<vmem>>, vector<1x1x8xf32>
    tpu.vector_store %arg5[%c0_10, %c0_11, %c0_12], %11 {strides = array<i32>} : memref<1x1x8xf32, #tpu.memory_space<vmem>>, vector<1x1x8xf32>,
    return
  }
  func.func @transform_0(%arg0: i32) -> (i32, i32) {
    %c0_i32 = arith.constant 0 : i32
    %c0_i32_0 = arith.constant 0 : i32
    return %arg0, %c0_i32 : i32, i32
  }
  func.func @transform_1(%arg0: i32) -> (i32, i32) {
    %c0_i32 = arith.constant 0 : i32
    %c0_i32_0 = arith.constant 0 : i32
    %c0_i32_1 = arith.constant 0 : i32
    return %c0_i32, %c0_i32_0 : i32, i32
  }
  func.func @transform_2(%arg0: i32) -> (i32, i32) {
    %c0_i32 = arith.constant 0 : i32
    %c0_i32_0 = arith.constant 0 : i32
    return %arg0, %c0_i32 : i32, i32
  }
  func.func @transform_3(%arg0: i32) -> (i32, i32, i32) {
    %c0_i32 = arith.constant 0 : i32
    %c0_i32_0 = arith.constant 0 : i32
    %c0_i32_1 = arith.constant 0 : i32
    return %arg0, %c0_i32, %c0_i32_0 : i32, i32, i32
  }
  func.func @transform_4(%arg0: i32) -> (i32, i32, i32) {
    %c0_i32 = arith.constant 0 : i32
    %c0_i32_0 = arith.constant 0 : i32
    %c0_i32_1 = arith.constant 0 : i32
    return %arg0, %c0_i32, %c0_i32_0 : i32, i32, i32
  }
}

module attributes {stable_mosaic.version = 11 : i64} {
  func.func @_bn_gelu_kernel(%arg0: i32, %arg1: memref<256x8xf32, #tpu.memory_space<vmem>>, %arg2: memref<1x8xf32, #tpu.memory_space<vmem>>, %arg3: memref<1x8xf32, #tpu.memory_space<vmem>>, %arg4: memref<256x8xbf16, #tpu.memory_space<vmem>>) attributes {dimension_semantics = [#tpu.dimension_semantics<parallel>], iteration_bounds = array<i64: 2>, scalar_prefetch = 0 : i64, scratch_operands = 0 : i64, tpu.core_type = #tpu.core_type<tc>, window_params = [{transform_indices = @transform_0, window_bounds = array<i64: 256, 8>}, {pipeline_mode = #tpu.pipeline_mode<synchronous>, transform_indices = @transform_1, window_bounds = array<i64: 1, 8>}, {pipeline_mode = #tpu.pipeline_mode<synchronous>, transform_indices = @transform_2, window_bounds = array<i64: 1, 8>}, {transform_indices = @transform_3, window_bounds = array<i64: 256, 8>}]} {
    %c0 = arith.constant 0 : index
    %c0_0 = arith.constant 0 : index
    %0 = vector.load %arg1[%c0, %c0_0] : memref<256x8xf32, #tpu.memory_space<vmem>>, vector<256x8xf32>
    %c0_1 = arith.constant 0 : index
    %c0_2 = arith.constant 0 : index
    %1 = vector.load %arg2[%c0_1, %c0_2] : memref<1x8xf32, #tpu.memory_space<vmem>>, vector<1x8xf32>
    %2 = vector.broadcast %1 : vector<1x8xf32> to vector<256x8xf32>
    %3 = arith.mulf %0, %2 : vector<256x8xf32>
    %c0_3 = arith.constant 0 : index
    %c0_4 = arith.constant 0 : index
    %4 = vector.load %arg3[%c0_3, %c0_4] : memref<1x8xf32, #tpu.memory_space<vmem>>, vector<1x8xf32>
    %5 = vector.broadcast %4 : vector<1x8xf32> to vector<256x8xf32>
    %6 = arith.addf %3, %5 : vector<256x8xf32>
    %cst = arith.constant 5.000000e-01 : f32
    %7 = vector.broadcast %cst : f32 to vector<256x8xf32>
    %8 = arith.mulf %7, %6 : vector<256x8xf32>
    %9 = arith.mulf %6, %6 : vector<256x8xf32>
    %10 = arith.mulf %9, %6 : vector<256x8xf32>
    %cst_5 = arith.constant 4.471500e-02 : f32
    %11 = vector.broadcast %cst_5 : f32 to vector<256x8xf32>
    %12 = arith.mulf %11, %10 : vector<256x8xf32>
    %13 = arith.addf %6, %12 : vector<256x8xf32>
    %cst_6 = arith.constant 0.797884583 : f32
    %14 = vector.broadcast %cst_6 : f32 to vector<256x8xf32>
    %15 = arith.mulf %14, %13 : vector<256x8xf32>
    %16 = math.tanh %15 : vector<256x8xf32>
    %cst_7 = arith.constant 1.000000e+00 : f32
    %17 = vector.broadcast %cst_7 : f32 to vector<256x8xf32>
    %18 = arith.addf %17, %16 : vector<256x8xf32>
    %19 = arith.mulf %8, %18 : vector<256x8xf32>
    %20 = arith.truncf %19 : vector<256x8xf32> to vector<256x8xbf16>
    %c0_8 = arith.constant 0 : index
    %c0_9 = arith.constant 0 : index
    %21 = vector.load %arg4[%c0_8, %c0_9] : memref<256x8xbf16, #tpu.memory_space<vmem>>, vector<256x8xbf16>
    tpu.vector_store %arg4[%c0_8, %c0_9], %20 {strides = array<i32>} : memref<256x8xbf16, #tpu.memory_space<vmem>>, vector<256x8xbf16>,
    return
  }
  func.func @transform_0(%arg0: i32) -> (i32, i32) {
    %c0_i32 = arith.constant 0 : i32
    %c0_i32_0 = arith.constant 0 : i32
    return %arg0, %c0_i32 : i32, i32
  }
  func.func @transform_1(%arg0: i32) -> (i32, i32) {
    %c0_i32 = arith.constant 0 : i32
    %c0_i32_0 = arith.constant 0 : i32
    %c0_i32_1 = arith.constant 0 : i32
    return %c0_i32, %c0_i32_0 : i32, i32
  }
  func.func @transform_2(%arg0: i32) -> (i32, i32) {
    %c0_i32 = arith.constant 0 : i32
    %c0_i32_0 = arith.constant 0 : i32
    %c0_i32_1 = arith.constant 0 : i32
    return %c0_i32, %c0_i32_0 : i32, i32
  }
  func.func @transform_3(%arg0: i32) -> (i32, i32) {
    %c0_i32 = arith.constant 0 : i32
    %c0_i32_0 = arith.constant 0 : i32
    return %arg0, %c0_i32 : i32, i32
  }
}

module attributes {stable_mosaic.version = 11 : i64} {
  func.func @_bn_gelu_pool_kernel(%arg0: i32, %arg1: i32, %arg2: memref<1x16x16x8xf32, #tpu.memory_space<vmem>>, %arg3: memref<1x8xf32, #tpu.memory_space<vmem>>, %arg4: memref<1x8xf32, #tpu.memory_space<vmem>>, %arg5: memref<1x8x8x8xf32, #tpu.memory_space<vmem>>, %arg6: memref<16x16x8xf32, #tpu.memory_space<vmem>>, %arg7: memref<16x8x8xf32, #tpu.memory_space<vmem>>) attributes {dimension_semantics = [#tpu.dimension_semantics<parallel>, #tpu.dimension_semantics<parallel>], iteration_bounds = array<i64: 2, 1>, scalar_prefetch = 0 : i64, scratch_operands = 2 : i64, tpu.core_type = #tpu.core_type<tc>, window_params = [{transform_indices = @transform_0, window_bounds = array<i64: 1, 16, 16, 8>}, {pipeline_mode = #tpu.pipeline_mode<synchronous>, transform_indices = @transform_1, window_bounds = array<i64: 1, 8>}, {pipeline_mode = #tpu.pipeline_mode<synchronous>, transform_indices = @transform_2, window_bounds = array<i64: 1, 8>}, {transform_indices = @transform_3, window_bounds = array<i64: 1, 8, 8, 8>}]} {
    %c0 = arith.constant 0 : index
    %c0_0 = arith.constant 0 : index
    %c0_1 = arith.constant 0 : index
    %c0_2 = arith.constant 0 : index
    %0 = vector.load %arg2[%c0, %c0_0, %c0_1, %c0_2] : memref<1x16x16x8xf32, #tpu.memory_space<vmem>>, vector<1x16x16x8xf32>
    %1 = vector.shape_cast %0 : vector<1x16x16x8xf32> to vector<16x16x8xf32>
    %c0_3 = arith.constant 0 : index
    %c0_4 = arith.constant 0 : index
    %2 = vector.load %arg3[%c0_3, %c0_4] : memref<1x8xf32, #tpu.memory_space<vmem>>, vector<1x8xf32>
    %3 = vector.shape_cast %2 : vector<1x8xf32> to vector<1x1x8xf32>
    %4 = vector.broadcast %3 : vector<1x1x8xf32> to vector<16x16x8xf32>
    %5 = arith.mulf %1, %4 : vector<16x16x8xf32>
    %c0_5 = arith.constant 0 : index
    %c0_6 = arith.constant 0 : index
    %6 = vector.load %arg4[%c0_5, %c0_6] : memref<1x8xf32, #tpu.memory_space<vmem>>, vector<1x8xf32>
    %7 = vector.shape_cast %6 : vector<1x8xf32> to vector<1x1x8xf32>
    %8 = vector.broadcast %7 : vector<1x1x8xf32> to vector<16x16x8xf32>
    %9 = arith.addf %5, %8 : vector<16x16x8xf32>
    %cst = arith.constant 5.000000e-01 : f32
    %10 = vector.broadcast %cst : f32 to vector<16x16x8xf32>
    %11 = arith.mulf %10, %9 : vector<16x16x8xf32>
    %12 = arith.mulf %9, %9 : vector<16x16x8xf32>
    %13 = arith.mulf %12, %9 : vector<16x16x8xf32>
    %cst_7 = arith.constant 4.471500e-02 : f32
    %14 = vector.broadcast %cst_7 : f32 to vector<16x16x8xf32>
    %15 = arith.mulf %14, %13 : vector<16x16x8xf32>
    %16 = arith.addf %9, %15 : vector<16x16x8xf32>
    %cst_8 = arith.constant 0.797884583 : f32
    %17 = vector.broadcast %cst_8 : f32 to vector<16x16x8xf32>
    %18 = arith.mulf %17, %16 : vector<16x16x8xf32>
    %19 = math.tanh %18 : vector<16x16x8xf32>
    %cst_9 = arith.constant 1.000000e+00 : f32
    %20 = vector.broadcast %cst_9 : f32 to vector<16x16x8xf32>
    %21 = arith.addf %20, %19 : vector<16x16x8xf32>
    %22 = arith.mulf %11, %21 : vector<16x16x8xf32>
    %c0_10 = arith.constant 0 : index
    %c0_11 = arith.constant 0 : index
    %c0_12 = arith.constant 0 : index
    %23 = vector.load %arg6[%c0_10, %c0_11, %c0_12] : memref<16x16x8xf32, #tpu.memory_space<vmem>>, vector<16x16x8xf32>
    tpu.vector_store %arg6[%c0_10, %c0_11, %c0_12], %22 {strides = array<i32>} : memref<16x16x8xf32, #tpu.memory_space<vmem>>, vector<16x16x8xf32>,
    %c0_13 = arith.constant 0 : index
    %c0_14 = arith.constant 0 : index
    %c0_15 = arith.constant 0 : index
    %24 = tpu.strided_load %arg6[%c0_13, %c0_14, %c0_15] {strides = array<i32: 1, 2, 1>} : memref<16x16x8xf32, #tpu.memory_space<vmem>>, vector<16x8x8xf32>
    %c0_16 = arith.constant 0 : index
    %c1 = arith.constant 1 : index
    %c0_17 = arith.constant 0 : index
    %25 = tpu.strided_load %arg6[%c0_16, %c1, %c0_17] {strides = array<i32: 1, 2, 1>} : memref<16x16x8xf32, #tpu.memory_space<vmem>>, vector<16x8x8xf32>
    %26 = arith.maximumf %24, %25 : vector<16x8x8xf32>
    %c0_18 = arith.constant 0 : index
    %c0_19 = arith.constant 0 : index
    %c0_20 = arith.constant 0 : index
    %27 = vector.load %arg7[%c0_18, %c0_19, %c0_20] : memref<16x8x8xf32, #tpu.memory_space<vmem>>, vector<16x8x8xf32>
    tpu.vector_store %arg7[%c0_18, %c0_19, %c0_20], %26 {strides = array<i32>} : memref<16x8x8xf32, #tpu.memory_space<vmem>>, vector<16x8x8xf32>,
    %c0_21 = arith.constant 0 : index
    %c0_22 = arith.constant 0 : index
    %c0_23 = arith.constant 0 : index
    %28 = tpu.strided_load %arg7[%c0_21, %c0_22, %c0_23] {strides = array<i32: 2, 1, 1>} : memref<16x8x8xf32, #tpu.memory_space<vmem>>, vector<8x8x8xf32>
    %c1_24 = arith.constant 1 : index
    %c0_25 = arith.constant 0 : index
    %c0_26 = arith.constant 0 : index
    %29 = tpu.strided_load %arg7[%c1_24, %c0_25, %c0_26] {strides = array<i32: 2, 1, 1>} : memref<16x8x8xf32, #tpu.memory_space<vmem>>, vector<8x8x8xf32>
    %30 = arith.maximumf %28, %29 : vector<8x8x8xf32>
    %c0_27 = arith.constant 0 : index
    %c0_28 = arith.constant 0 : index
    %c0_29 = arith.constant 0 : index
    %c0_30 = arith.constant 0 : index
    %31 = vector.load %arg5[%c0_27, %c0_28, %c0_29, %c0_30] : memref<1x8x8x8xf32, #tpu.memory_space<vmem>>, vector<1x8x8x8xf32>
    %32 = vector.shape_cast %31 : vector<1x8x8x8xf32> to vector<8x8x8xf32>
    %33 = vector.shape_cast %30 : vector<8x8x8xf32> to vector<1x8x8x8xf32>
    tpu.vector_store %arg5[%c0_27, %c0_28, %c0_29, %c0_30], %33 {strides = array<i32>} : memref<1x8x8x8xf32, #tpu.memory_space<vmem>>, vector<1x8x8x8xf32>,
    return
  }
  func.func @transform_0(%arg0: i32, %arg1: i32) -> (i32, i32, i32, i32) {
    %c0_i32 = arith.constant 0 : i32
    %c0_i32_0 = arith.constant 0 : i32
    %c0_i32_1 = arith.constant 0 : i32
    return %arg0, %arg1, %c0_i32, %c0_i32_0 : i32, i32, i32, i32
  }
  func.func @transform_1(%arg0: i32, %arg1: i32) -> (i32, i32) {
    %c0_i32 = arith.constant 0 : i32
    %c0_i32_0 = arith.constant 0 : i32
    %c0_i32_1 = arith.constant 0 : i32
    return %c0_i32, %c0_i32_0 : i32, i32
  }
  func.func @transform_2(%arg0: i32, %arg1: i32) -> (i32, i32) {
    %c0_i32 = arith.constant 0 : i32
    %c0_i32_0 = arith.constant 0 : i32
    %c0_i32_1 = arith.constant 0 : i32
    return %c0_i32, %c0_i32_0 : i32, i32
  }
  func.func @transform_3(%arg0: i32, %arg1: i32) -> (i32, i32, i32, i32) {
    %c0_i32 = arith.constant 0 : i32
    %c0_i32_0 = arith.constant 0 : i32
    %c0_i32_1 = arith.constant 0 : i32
    return %arg0, %arg1, %c0_i32, %c0_i32_0 : i32, i32, i32, i32
  }
}

module attributes {stable_mosaic.version = 11 : i64} {
  func.func @_conv_stats_kernel(%arg0: i32, %arg1: memref<256x72xbf16, #tpu.memory_space<vmem>>, %arg2: memref<72x8xbf16, #tpu.memory_space<vmem>>, %arg3: memref<256x8xf32, #tpu.memory_space<vmem>>, %arg4: memref<1x1x8xf32, #tpu.memory_space<vmem>>, %arg5: memref<1x1x8xf32, #tpu.memory_space<vmem>>) attributes {dimension_semantics = [#tpu.dimension_semantics<parallel>], iteration_bounds = array<i64: 2>, scalar_prefetch = 0 : i64, scratch_operands = 0 : i64, tpu.core_type = #tpu.core_type<tc>, window_params = [{transform_indices = @transform_0, window_bounds = array<i64: 256, 72>}, {pipeline_mode = #tpu.pipeline_mode<synchronous>, transform_indices = @transform_1, window_bounds = array<i64: 72, 8>}, {transform_indices = @transform_2, window_bounds = array<i64: 256, 8>}, {transform_indices = @transform_3, window_bounds = array<i64: 1, 1, 8>}, {transform_indices = @transform_4, window_bounds = array<i64: 1, 1, 8>}]} {
    %c0 = arith.constant 0 : index
    %c0_0 = arith.constant 0 : index
    %0 = vector.load %arg1[%c0, %c0_0] : memref<256x72xbf16, #tpu.memory_space<vmem>>, vector<256x72xbf16>
    %c0_1 = arith.constant 0 : index
    %c0_2 = arith.constant 0 : index
    %1 = vector.load %arg2[%c0_1, %c0_2] : memref<72x8xbf16, #tpu.memory_space<vmem>>, vector<72x8xbf16>
    %cst = arith.constant dense<0.000000e+00> : vector<256x8xf32>
    %2 = tpu.matmul %0, %1, %cst {dimension_numbers = #tpu.dot_dimension_numbers<[1], [0], [0], [1], [0, 0, 1, 1], [], []>} : vector<256x72xbf16>, vector<72x8xbf16>, vector<256x8xf32> -> vector<256x8xf32>
    %c0_3 = arith.constant 0 : index
    %c0_4 = arith.constant 0 : index
    %3 = vector.load %arg3[%c0_3, %c0_4] : memref<256x8xf32, #tpu.memory_space<vmem>>, vector<256x8xf32>
    tpu.vector_store %arg3[%c0_3, %c0_4], %2 {strides = array<i32>} : memref<256x8xf32, #tpu.memory_space<vmem>>, vector<256x8xf32>,
    %cst_5 = arith.constant dense<0.000000e+00> : vector<8xf32>
    %4 = vector.multi_reduction <add>, %2, %cst_5 [0] : vector<256x8xf32> to vector<8xf32>
    %5 = vector.shape_cast %4 : vector<8xf32> to vector<1x8xf32>
    %6 = vector.shape_cast %5 : vector<1x8xf32> to vector<1x1x8xf32>
    %c0_6 = arith.constant 0 : index
    %c0_7 = arith.constant 0 : index
    %c0_8 = arith.constant 0 : index
    %7 = vector.load %arg4[%c0_6, %c0_7, %c0_8] : memref<1x1x8xf32, #tpu.memory_space<vmem>>, vector<1x1x8xf32>
    tpu.vector_store %arg4[%c0_6, %c0_7, %c0_8], %6 {strides = array<i32>} : memref<1x1x8xf32, #tpu.memory_space<vmem>>, vector<1x1x8xf32>,
    %8 = arith.mulf %2, %2 : vector<256x8xf32>
    %cst_9 = arith.constant dense<0.000000e+00> : vector<8xf32>
    %9 = vector.multi_reduction <add>, %8, %cst_9 [0] : vector<256x8xf32> to vector<8xf32>
    %10 = vector.shape_cast %9 : vector<8xf32> to vector<1x8xf32>
    %11 = vector.shape_cast %10 : vector<1x8xf32> to vector<1x1x8xf32>
    %c0_10 = arith.constant 0 : index
    %c0_11 = arith.constant 0 : index
    %c0_12 = arith.constant 0 : index
    %12 = vector.load %arg5[%c0_10, %c0_11, %c0_12] : memref<1x1x8xf32, #tpu.memory_space<vmem>>, vector<1x1x8xf32>
    tpu.vector_store %arg5[%c0_10, %c0_11, %c0_12], %11 {strides = array<i32>} : memref<1x1x8xf32, #tpu.memory_space<vmem>>, vector<1x1x8xf32>,
    return
  }
  func.func @transform_0(%arg0: i32) -> (i32, i32) {
    %c0_i32 = arith.constant 0 : i32
    %c0_i32_0 = arith.constant 0 : i32
    return %arg0, %c0_i32 : i32, i32
  }
  func.func @transform_1(%arg0: i32) -> (i32, i32) {
    %c0_i32 = arith.constant 0 : i32
    %c0_i32_0 = arith.constant 0 : i32
    %c0_i32_1 = arith.constant 0 : i32
    return %c0_i32, %c0_i32_0 : i32, i32
  }
  func.func @transform_2(%arg0: i32) -> (i32, i32) {
    %c0_i32 = arith.constant 0 : i32
    %c0_i32_0 = arith.constant 0 : i32
    return %arg0, %c0_i32 : i32, i32
  }
  func.func @transform_3(%arg0: i32) -> (i32, i32, i32) {
    %c0_i32 = arith.constant 0 : i32
    %c0_i32_0 = arith.constant 0 : i32
    %c0_i32_1 = arith.constant 0 : i32
    return %arg0, %c0_i32, %c0_i32_0 : i32, i32, i32
  }
  func.func @transform_4(%arg0: i32) -> (i32, i32, i32) {
    %c0_i32 = arith.constant 0 : i32
    %c0_i32_0 = arith.constant 0 : i32
    %c0_i32_1 = arith.constant 0 : i32
    return %arg0, %c0_i32, %c0_i32_0 : i32, i32, i32
  }
}

</mosaic_0001>

<bundles_post_ra>
// kernel: unet_down.5
= control target key start
LH: loop header
LB: loop body
LE: loop exit
PB: predicated region body
PF: predicated region fallthrough
CT: control target
= control target key end

     0   :  { %s966_s12 = smov 0   ;;  %s1377_s0 = inlined_call_operand.vmem [shape: f32[512,8], index: 0, kind: input, shape index: {}]   ;;  %s1378_s1 = inlined_call_operand.vmem [shape: f32[1,8], index: 1, kind: input, shape index: {}]   ;;  %s1379_s2 = inlined_call_operand.vmem [shape: f32[1,8], index: 2, kind: input, shape index: {}]   ;;  %s1380_s3 = inlined_call_operand.vmem [shape: bf16[512,8], index: 3, kind: output, shape index: {}]  }
   0x1 LB: > { %s789_s13 = sadd.s32 4294967295, %s944_s12   ;;  %p793_p0 = scmp.ge.s32.totalorder %s944_s12, 1  ;;  %s944_s12 = sphi %s966_s12, %s13_s12  }
   0x2   : > { %p138_p1 = scmp.lt.s32.totalorder %s944_s12, 3 }
   0x4   : > { %p139_p2 = pnand %p793_p0, %p138_p1 }
   0x5   : > { %s794_s14 = sshll.u32 (!%p139_p2), %s789_s13, 5 }
   0x6   : > { %142 = sbr.rel (%p139_p2) target bundleno = 129 (0x81), region = 32  ;;  %p163_p3 = scmp.lt.s32.totalorder (!%p139_p2), %s794_s14, 63 }
   0xb   : > { %s1382_s14 = smov (!%p163_p3, %s794_s14), 63  ;;  %v980_v0 = vld [vmem:[%s1378_s1] ss:$0 sm:$0xff]  ;;  %vm700_vm0 = vcmask 60416  }
   0xc   : > { %s795_s15 = sshll.u32 %s1382_s14, 3  ;;  %v990_v1 = vld [vmem:[%s1379_s2] ss:$0 sm:$0xff]  ;;  %s797_s23 = sshll.u32 %s1382_s14, 2 }
   0xd   : > { %s985_s20 = scalar_lea.vmem %s1377_s0, %s795_s15  ;;  %s1115_s26 = scalar_lea.vmem %s1380_s3, %s797_s23 }
   0xe   : > { %v174_v2 = vld [vmem:[%s985_s20] sm:$0xff]  ;;  %v175_v3 = vld [vmem:[%s985_s20 + $0x8] sm:$0xff]  ;;  %v176_v4 = vld [vmem:[%s985_s20 + $0x10] sm:$0xff] }
   0xf   : > { %v213_v5 = vmul.f32 %v980_v0, %v174_v2  ;;  %v214_v6 = vmul.f32 %v980_v0, %v175_v3  ;;  %v215_v7 = vmul.f32 %v980_v0, %v176_v4  ;;  %v177_v8 = vld [vmem:[%s985_s20 + $0x18] sm:$0xff]  ;;  %v178_v9 = vld [vmem:[%s985_s20 + $0x20] sm:$0xff]  ;;  %v179_v10 = vld [vmem:[%s985_s20 + $0x28] sm:$0xff] }
  0x10   : > { %v216_v11 = vmul.f32 %v980_v0, %v177_v8  ;;  %v217_v12 = vmul.f32 %v980_v0, %v178_v9  ;;  %v218_v13 = vmul.f32 %v980_v0, %v179_v10  ;;  %v180_v14 = vld [vmem:[%s985_s20 + $0x30] sm:$0xff]  ;;  %v181_v21 = vld [vmem:[%s985_s20 + $0x38] sm:$0xff]  ;;  %v182_v51 = vld [vmem:[%s985_s20 + $0x40] sm:$0xff] }
  0x11   : > { %v252_v15 = vadd.f32 %v990_v1, %v213_v5  ;;  %v253_v16 = vadd.f32 %v990_v1, %v214_v6  ;;  %v254_v17 = vadd.f32 %v990_v1, %v215_v7  ;;  %v219_v24 = vmul.f32 %v980_v0, %v180_v14  ;;  %v183_v56 = vld [vmem:[%s985_s20 + $0x48] sm:$0xff]  ;;  %v184_v61 = vld [vmem:[%s985_s20 + $0x50] sm:$0xff]  ;;  %v185_v3 = vld [vmem:[%s985_s20 + $0x58] sm:$0xff] }
  0x12   : > { %v255_v18 = vadd.f32 %v990_v1, %v216_v11  ;;  %v1010_v19 = vadd.f32 %v990_v1, %v217_v12  ;;  %v1013_v20 = vadd.f32 %v990_v1, %v218_v13  ;;  %v220_v30 = vmul.f32 %v980_v0, %v181_v21 }
  0x13   : > { %v316_v22 = vmul.f32 %v252_v15, %v252_v15  ;;  %v317_v23 = vmul.f32 %v253_v16, %v253_v16  ;;  %v318_v25 = vmul.f32 %v254_v17, %v254_v17  ;;  %v1020_v31 = vmul.f32 0.5, %v252_v15 }
  0x14   : > { %v319_v26 = vmul.f32 %v255_v18, %v255_v18  ;;  %v320_v29 = vmul.f32 %v1010_v19, %v1010_v19  ;;  %v321_v34 = vmul.f32 %v1013_v20, %v1013_v20  ;;  %v1026_v38 = vadd.f32 %v990_v1, %v219_v24 }
  0x15   : > { %v348_v27 = vmul.f32 %v316_v22, %v252_v15  ;;  %v349_v28 = vmul.f32 %v317_v23, %v253_v16  ;;  %v350_v32 = vmul.f32 %v318_v25, %v254_v17  ;;  %v1028_v39 = vmul.f32 0.5, %v253_v16 }
  0x16   : > { %v351_v33 = vmul.f32 %v319_v26, %v255_v18  ;;  %v352_v37 = vmul.f32 %v320_v29, %v1010_v19  ;;  %v353_v42 = vmul.f32 %v321_v34, %v1013_v20  ;;  %v1032_v46 = vadd.f32 %v990_v1, %v220_v30 }
  0x17   : > { %v380_v35 = vmul.f32 0.044715, %v348_v27  ;;  %v381_v36 = vmul.f32 0.044715, %v349_v28  ;;  %v382_v40 = vmul.f32 0.044715, %v350_v32  ;;  %v322_v50 = vmul.f32 %v1026_v38, %v1026_v38 }
  0x18   : > { %v383_v41 = vmul.f32 0.044715, %v351_v33  ;;  %v384_v45 = vmul.f32 0.044715, %v352_v37  ;;  %v385_v49 = vmul.f32 0.044715, %v353_v42  ;;  %v323_v63 = vmul.f32 %v1032_v46, %v1032_v46 }
  0x19   : > { %v412_v43 = vadd.f32 %v380_v35, %v252_v15  ;;  %v413_v44 = vadd.f32 %v381_v36, %v253_v16  ;;  %v414_v47 = vadd.f32 %v382_v40, %v254_v17  ;;  %v1037_v54 = vmul.f32 0.5, %v254_v17  ;;  %v186_v16 = vld [vmem:[%s985_s20 + $0x60] sm:$0xff]  ;;  %v187_v17 = vld [vmem:[%s985_s20 + $0x68] sm:$0xff]  ;;  %v188_v42 = vld [vmem:[%s985_s20 + $0x70] sm:$0xff] }
  0x1a   : > { %v415_v48 = vadd.f32 %v383_v41, %v255_v18  ;;  %v416_v55 = vadd.f32 %v384_v45, %v1010_v19  ;;  %v417_v59 = vadd.f32 %v385_v49, %v1013_v20  ;;  %v354_v60 = vmul.f32 %v322_v50, %v1026_v38 }
  0x1b   : > { %v444_v52 = vmul.f32 0.7978846, %v412_v43  ;;  %v445_v53 = vmul.f32 0.7978846, %v413_v44  ;;  %v446_v57 = vmul.f32 0.7978846, %v414_v47  ;;  %v221_v2 = vmul.f32 %v980_v0, %v182_v51 }
  0x1c   : > { %v447_v58 = vmul.f32 0.7978846, %v415_v48  ;;  %v448_v62 = vmul.f32 0.7978846, %v416_v55  ;;  %v449_v4 = vmul.f32 0.7978846, %v417_v59  ;;  %v222_v6 = vmul.f32 %v980_v0, %v183_v56 }
  0x1d   : > { %874 = vtanh.f32 %v444_v52  ;;  %v386_v5 = vmul.f32 0.044715, %v354_v60  ;;  %v355_v7 = vmul.f32 %v323_v63, %v1032_v46  ;;  %v260_v8 = vadd.f32 %v990_v1, %v221_v2 }
  0x1e   : > { %876 = vtanh.f32 %v445_v53  ;;  %v223_v9 = vmul.f32 %v980_v0, %v184_v61  ;;  %v1054_v11 = vadd.f32 %v990_v1, %v222_v6  ;;  %v224_v12 = vmul.f32 %v980_v0, %v185_v3 }
  0x1f   : > { %878 = vtanh.f32 %v446_v57  ;;  %v418_v10 = vadd.f32 %v386_v5, %v1026_v38  ;;  %v1057_v13 = vmul.f32 0.5, %v255_v18  ;;  %v387_v14 = vmul.f32 0.044715, %v355_v7 }
  0x20   : > { %880 = vtanh.f32 %v447_v58  ;;  %v324_v15 = vmul.f32 %v260_v8, %v260_v8  ;;  %v1062_v21 = vmul.f32 0.5, %v1010_v19  ;;  %v325_v23 = vmul.f32 %v1054_v11, %v1054_v11 }
  0x21   : > { %882 = vtanh.f32 %v448_v62  ;;  %v450_v22 = vmul.f32 0.7978846, %v418_v10  ;;  %v419_v24 = vadd.f32 %v387_v14, %v1032_v46  ;;  %v1068_v26 = vadd.f32 %v990_v1, %v223_v9 }
  0x22   : > { %884 = vtanh.f32 %v449_v4  ;;  %v356_v25 = vmul.f32 %v324_v15, %v260_v8  ;;  %v1071_v18 = vadd.f32 %v990_v1, %v224_v12  ;;  %v357_v27 = vmul.f32 %v325_v23, %v1054_v11 }
  0x23   : > { %886 = vtanh.f32 %v450_v22  ;;  %v225_v19 = vmul.f32 %v980_v0, %v186_v16  ;;  %v226_v28 = vmul.f32 %v980_v0, %v187_v17  ;;  %v1077_v29 = vmul.f32 0.5, %v1013_v20 }
  0x24   : > { %v451_v30 = vmul.f32 0.7978846, %v419_v24  ;;  %v388_v32 = vmul.f32 0.044715, %v356_v25  ;;  %v326_v33 = vmul.f32 %v1068_v26, %v1068_v26  ;;  %v1082_v34 = vmul.f32 0.5, %v1026_v38  ;;  %v189_v24 = vld [vmem:[%s985_s20 + $0x78] sm:$0xff] }
  0x25   : > { %v389_v35 = vmul.f32 0.044715, %v357_v27  ;;  %v327_v36 = vmul.f32 %v1071_v18, %v1071_v18  ;;  %v1087_v37 = vadd.f32 %v990_v1, %v225_v19  ;;  %v1091_v41 = vadd.f32 %v990_v1, %v226_v28 }
  0x26   : > { %888 = vtanh.f32 %v451_v30  ;;  %v420_v40 = vadd.f32 %v388_v32, %v260_v8  ;;  %v358_v20 = vmul.f32 %v326_v33, %v1068_v26  ;;  %v1095_v43 = vmul.f32 0.5, %v1032_v46  ;;  %v190_v33 = vld [vmem:[%s985_s20 + $0x80] sm:$0xff] }
  0x27   : > { %v421_v38 = vadd.f32 %v389_v35, %v1054_v11  ;;  %v359_v44 = vmul.f32 %v327_v36, %v1071_v18  ;;  %v328_v45 = vmul.f32 %v1087_v37, %v1087_v37  ;;  %v1101_v47 = vmul.f32 0.5, %v260_v8 }
  0x28   : > { %v452_v48 = vmul.f32 0.7978846, %v420_v40  ;;  %v390_v49 = vmul.f32 0.044715, %v358_v20  ;;  %v329_v50 = vmul.f32 %v1091_v41, %v1091_v41  ;;  %v227_v55 = vmul.f32 %v980_v0, %v188_v42  ;;  %v191_v40 = vld [vmem:[%s985_s20 + $0x88] sm:$0xff]  ;;  %v192_v20 = vld [vmem:[%s985_s20 + $0x90] sm:$0xff] }
  0x29   : > { %v453_v52 = vmul.f32 0.7978846, %v421_v38  ;;  %v391_v53 = vmul.f32 0.044715, %v359_v44  ;;  %v360_v46 = vmul.f32 %v328_v45, %v1087_v37  ;;  %v228_v36 = vmul.f32 %v980_v0, %v189_v24 }
  0x2a   : > { %v875_v51 = vpop.eup %874  ;;  %890 = vtanh.f32 %v452_v48  ;;  %v422_v58 = vadd.f32 %v390_v49, %v1068_v26  ;;  %v361_v59 = vmul.f32 %v329_v50, %v1091_v41  ;;  %v1130_v32 = vadd.f32 %v990_v1, %v227_v55 }
  0x2b   : > { %v877_v56 = vpop.eup %876  ;;  %v508_v57 = vadd.f32 1.0, %v875_v51  ;;  %892 = vtanh.f32 %v453_v52  ;;  %v423_v62 = vadd.f32 %v391_v53, %v1071_v18  ;;  %v392_v63 = vmul.f32 0.044715, %v360_v46 }
  0x2c   : > { %v879_v60 = vpop.eup %878  ;;  %v509_v61 = vadd.f32 1.0, %v877_v56  ;;  %v454_v5 = vmul.f32 0.7978846, %v422_v58  ;;  %v393_v6 = vmul.f32 0.044715, %v361_v59  ;;  %v293_v44 = vmul.f32 0.5, %v1054_v11 }
  0x2d   : > { %v881_v2 = vpop.eup %880  ;;  %v540_v3 = vmul.f32 %v508_v57, %v1020_v31  ;;  %v510_v4 = vadd.f32 1.0, %v879_v60  ;;  %v455_v10 = vmul.f32 0.7978846, %v423_v62  ;;  %v424_v12 = vadd.f32 %v392_v63, %v1087_v37 }
  0x2e   : > { %v883_v7 = vpop.eup %882  ;;  %v541_v8 = vmul.f32 %v509_v61, %v1028_v39  ;;  %v511_v9 = vadd.f32 1.0, %v881_v2  ;;  %894 = vtanh.f32 %v454_v5  ;;  %v330_v45 = vmul.f32 %v1130_v32, %v1130_v32 }
  0x2f   : > { %v885_v14 = vpop.eup %884  ;;  %v834_v31 = vpack.c.bf16 %v540_v3, %v540_v3  ;;  %v542_v15 = vmul.f32 %v510_v4, %v1037_v54  ;;  %v512_v16 = vadd.f32 1.0, %v883_v7  ;;  %896 = vtanh.f32 %v455_v10 }
  0x30   : > { %v835_v17 = vpack.c.bf16 %v541_v8, %v541_v8  ;;  %v543_v22 = vmul.f32 %v511_v9, %v1057_v13  ;;  %v513_v23 = vadd.f32 1.0, %v885_v14  ;;  %v887_v39 = vpop.eup %886  ;;  %v456_v19 = vmul.f32 0.7978846, %v424_v12 }
  0x31   : > { %701 = vst.msk [vmem:[%s1115_s26] sm:$0xf] %vm700_vm0, %v834_v31  ;;  %v836_v25 = vpack.c.bf16 %v542_v15, %v542_v15  ;;  %v544_v27 = vmul.f32 %v512_v16, %v1062_v21  ;;  %v425_v54 = vadd.f32 %v393_v6, %v1091_v41  ;;  %v514_v30 = vadd.f32 1.0, %v887_v39 }
  0x32   : > { %702 = vst.msk [vmem:[%s1115_s26 + $0x4] sm:$0xf] %vm700_vm0, %v835_v17  ;;  %v837_v28 = vpack.c.bf16 %v543_v22, %v543_v22  ;;  %v545_v13 = vmul.f32 %v513_v23, %v1077_v29  ;;  %898 = vtanh.f32 %v456_v19  ;;  %v1147_v49 = vadd.f32 %v990_v1, %v228_v36  ;;  %v194_v23 = vld [vmem:[%s985_s20 + $0xa0] sm:$0xff] }
  0x33   : > { %703 = vst.msk [vmem:[%s1115_s26 + $0x8] sm:$0xf] %vm700_vm0, %v836_v25  ;;  %v838_v35 = vpack.c.bf16 %v544_v27, %v544_v27  ;;  %v457_v21 = vmul.f32 0.7978846, %v425_v54  ;;  %v889_v42 = vpop.eup %888  ;;  %v546_v38 = vmul.f32 %v514_v30, %v1082_v34  ;;  %v229_v50 = vmul.f32 %v980_v0, %v190_v33 }
  0x34   : > { %704 = vst.msk [vmem:[%s1115_s26 + $0xc] sm:$0xf] %vm700_vm0, %v837_v28  ;;  %v839_v29 = vpack.c.bf16 %v545_v13, %v545_v13  ;;  %v515_v48 = vadd.f32 1.0, %v889_v42  ;;  %v362_v34 = vmul.f32 %v330_v45, %v1130_v32  ;;  %v230_v11 = vmul.f32 %v980_v0, %v191_v40  ;;  %v195_v42 = vld [vmem:[%s985_s20 + $0xa8] sm:$0xff] }
  0x35   : > { %705 = vst.msk [vmem:[%s1115_s26 + $0x10] sm:$0xf] %vm700_vm0, %v838_v35  ;;  %900 = vtanh.f32 %v457_v21  ;;  %v840_v51 = vpack.c.bf16 %v546_v38, %v546_v38  ;;  %v231_v52 = vmul.f32 %v980_v0, %v192_v20  ;;  %v294_v46 = vmul.f32 0.5, %v1068_v26  ;;  %v193_v26 = vld [vmem:[%s985_s20 + $0x98] sm:$0xff] }
  0x36   : > { %706 = vst.msk [vmem:[%s1115_s26 + $0x14] sm:$0xf] %vm700_vm0, %v839_v29  ;;  %v547_v53 = vmul.f32 %v515_v48, %v1095_v43  ;;  %v331_v55 = vmul.f32 %v1147_v49, %v1147_v49  ;;  %v1160_v56 = vadd.f32 %v990_v1, %v229_v50  ;;  %v295_v58 = vmul.f32 0.5, %v1071_v18 }
  0x37   : > { %v891_v57 = vpop.eup %890  ;;  %707 = vst.msk [vmem:[%s1115_s26 + $0x18] sm:$0xf] %vm700_vm0, %v840_v51  ;;  %v394_v59 = vmul.f32 0.044715, %v362_v34  ;;  %v1166_v60 = vadd.f32 %v990_v1, %v230_v11  ;;  %v1169_v43 = vadd.f32 %v990_v1, %v231_v52  ;;  %v296_v2 = vmul.f32 0.5, %v1087_v37 }
  0x38   : > { %v893_v61 = vpop.eup %892  ;;  %v841_v62 = vpack.c.bf16 %v547_v53, %v547_v53  ;;  %v516_v63 = vadd.f32 1.0, %v891_v57  ;;  %v363_v3 = vmul.f32 %v331_v55, %v1147_v49  ;;  %v297_v5 = vmul.f32 0.5, %v1091_v41  ;;  %v197_v55 = vld [vmem:[%s985_s20 + $0xb8] sm:$0xff] }
  0x39   : > { %v517_v4 = vadd.f32 1.0, %v893_v61  ;;  %v426_v18 = vadd.f32 %v394_v59, %v1130_v32  ;;  %v332_v6 = vmul.f32 %v1160_v56, %v1160_v56  ;;  %v333_v9 = vmul.f32 %v1166_v60, %v1166_v60 }
  0x3a   : > { %708 = vst.msk [vmem:[%s1115_s26 + $0x1c] sm:$0xf] %vm700_vm0, %v841_v62  ;;  %v548_v7 = vmul.f32 %v516_v63, %v1101_v47  ;;  %v395_v8 = vmul.f32 0.044715, %v363_v3  ;;  %v232_v37 = vmul.f32 %v980_v0, %v193_v26  ;;  %v334_v31 = vmul.f32 %v1169_v43, %v1169_v43  ;;  %v198_v63 = vld [vmem:[%s985_s20 + $0xc0] sm:$0xff] }
  0x3b   : > { %v895_v10 = vpop.eup %894  ;;  %v549_v12 = vmul.f32 %v517_v4, %v293_v44  ;;  %v458_v41 = vmul.f32 0.7978846, %v426_v18  ;;  %v364_v14 = vmul.f32 %v332_v6, %v1160_v56  ;;  %v365_v22 = vmul.f32 %v333_v9, %v1166_v60  ;;  %v199_v18 = vld [vmem:[%s985_s20 + $0xc8] sm:$0xff] }
  0x3c   : > { %v897_v15 = vpop.eup %896  ;;  %v842_v16 = vpack.c.bf16 %v548_v7, %v548_v7  ;;  %v518_v17 = vadd.f32 1.0, %v895_v10  ;;  %v427_v47 = vadd.f32 %v395_v8, %v1147_v49  ;;  %v366_v28 = vmul.f32 %v334_v31, %v1169_v43 }
  0x3d   : > { %v843_v24 = vpack.c.bf16 %v549_v12, %v549_v12  ;;  %v519_v39 = vadd.f32 1.0, %v897_v15  ;;  %902 = vtanh.f32 %v458_v41  ;;  %v396_v25 = vmul.f32 0.044715, %v364_v14 }
  0x3e   : > { %709 = vst.msk [vmem:[%s1115_s26 + $0x20] sm:$0xf] %vm700_vm0, %v842_v16  ;;  %v550_v27 = vmul.f32 %v518_v17, %v294_v46  ;;  %v459_v19 = vmul.f32 0.7978846, %v427_v47  ;;  %v397_v54 = vmul.f32 0.044715, %v365_v22  ;;  %v1197_v35 = vadd.f32 %v990_v1, %v232_v37 }
  0x3f   : > { %v899_v13 = vpop.eup %898  ;;  %710 = vst.msk [vmem:[%s1115_s26 + $0x24] sm:$0xf] %vm700_vm0, %v843_v24  ;;  %v551_v30 = vmul.f32 %v519_v39, %v295_v58  ;;  %v428_v33 = vadd.f32 %v396_v25, %v1160_v56  ;;  %v233_v21 = vmul.f32 %v980_v0, %v194_v23  ;;  %v398_v45 = vmul.f32 0.044715, %v366_v28  ;;  %v196_v46 = vld [vmem:[%s985_s20 + $0xb0] sm:$0xff] }
  0x40   : > { %v844_v36 = vpack.c.bf16 %v550_v27, %v550_v27  ;;  %v520_v40 = vadd.f32 1.0, %v899_v13  ;;  %904 = vtanh.f32 %v459_v19  ;;  %v429_v20 = vadd.f32 %v397_v54, %v1166_v60  ;;  %v200_v25 = vld [vmem:[%s985_s20 + $0xd0] sm:$0xff] }
  0x41   : > { %v845_v38 = vpack.c.bf16 %v551_v30, %v551_v30  ;;  %v460_v44 = vmul.f32 0.7978846, %v428_v33  ;;  %v335_v34 = vmul.f32 %v1197_v35, %v1197_v35  ;;  %v430_v11 = vadd.f32 %v398_v45, %v1169_v43 }
  0x42   : > { %v901_v29 = vpop.eup %900  ;;  %711 = vst.msk [vmem:[%s1115_s26 + $0x28] sm:$0xf] %vm700_vm0, %v844_v36  ;;  %v552_v48 = vmul.f32 %v520_v40, %v296_v2  ;;  %v461_v51 = vmul.f32 0.7978846, %v429_v20  ;;  %v1210_v52 = vadd.f32 %v990_v1, %v233_v21  ;;  %v234_v53 = vmul.f32 %v980_v0, %v195_v42 }
  0x43   : > { %v521_v50 = vadd.f32 1.0, %v901_v29  ;;  %712 = vst.msk [vmem:[%s1115_s26 + $0x2c] sm:$0xf] %vm700_vm0, %v845_v38  ;;  %906 = vtanh.f32 %v460_v44  ;;  %v367_v59 = vmul.f32 %v335_v34, %v1197_v35  ;;  %v462_v26 = vmul.f32 0.7978846, %v430_v11 }
  0x44   : > { %v846_v57 = vpack.c.bf16 %v552_v48, %v552_v48  ;;  %908 = vtanh.f32 %v461_v51  ;;  %v336_v61 = vmul.f32 %v1210_v52, %v1210_v52  ;;  %v1219_v62 = vadd.f32 %v990_v1, %v234_v53 }
  0x45   : > { %v553_v58 = vmul.f32 %v521_v50, %v297_v5  ;;  %v399_v3 = vmul.f32 0.044715, %v367_v59  ;;  %v235_v4 = vmul.f32 %v980_v0, %v196_v46  ;;  %v236_v5 = vmul.f32 %v980_v0, %v197_v55  ;;  %v201_v46 = vld [vmem:[%s985_s20 + $0xd8] sm:$0xff] }
  0x46   : > { %713 = vst.msk [vmem:[%s1115_s26 + $0x30] sm:$0xf] %vm700_vm0, %v846_v57  ;;  %v298_v6 = vmul.f32 0.5, %v1130_v32  ;;  %910 = vtanh.f32 %v462_v26  ;;  %v368_v7 = vmul.f32 %v336_v61, %v1210_v52  ;;  %v337_v8 = vmul.f32 %v1219_v62, %v1219_v62 }
  0x47   : > { %v847_v2 = vpack.c.bf16 %v553_v58, %v553_v58  ;;  %v431_v9 = vadd.f32 %v399_v3, %v1197_v35  ;;  %v1235_v37 = vadd.f32 %v990_v1, %v235_v4  ;;  %v1238_v10 = vadd.f32 %v990_v1, %v236_v5 }
  0x48   : > { %v237_v12 = vmul.f32 %v980_v0, %v198_v63  ;;  %v299_v32 = vmul.f32 0.5, %v1147_v49  ;;  %v400_v41 = vmul.f32 0.044715, %v368_v7  ;;  %v369_v14 = vmul.f32 %v337_v8, %v1219_v62 }
  0x49   : > { %714 = vst.msk [vmem:[%s1115_s26 + $0x34] sm:$0xf] %vm700_vm0, %v847_v2  ;;  %v238_v31 = vmul.f32 %v980_v0, %v199_v18  ;;  %v300_v16 = vmul.f32 0.5, %v1160_v56  ;;  %v301_v17 = vmul.f32 0.5, %v1166_v60  ;;  %v463_v47 = vmul.f32 0.7978846, %v431_v9 }
  0x4a   : > { %v903_v15 = vpop.eup %902  ;;  %v338_v22 = vmul.f32 %v1235_v37, %v1235_v37  ;;  %v432_v24 = vadd.f32 %v400_v41, %v1210_v52  ;;  %v401_v39 = vmul.f32 0.044715, %v369_v14  ;;  %v339_v49 = vmul.f32 %v1238_v10, %v1238_v10  ;;  %v202_v18 = vld [vmem:[%s985_s20 + $0xe0] sm:$0xff]  ;;  %v203_v9 = vld [vmem:[%s985_s20 + $0xe8] sm:$0xff] }
  0x4b   : > { %v522_v23 = vadd.f32 1.0, %v903_v15  ;;  %912 = vtanh.f32 %v463_v47  ;;  %v1254_v19 = vadd.f32 %v990_v1, %v237_v12  ;;  %v1257_v56 = vadd.f32 %v990_v1, %v238_v31  ;;  %v204_v12 = vld [vmem:[%s985_s20 + $0xf0] sm:$0xff] }
  0x4c   : > { %v370_v27 = vmul.f32 %v338_v22, %v1235_v37  ;;  %v464_v28 = vmul.f32 0.7978846, %v432_v24  ;;  %v433_v13 = vadd.f32 %v401_v39, %v1219_v62  ;;  %v371_v30 = vmul.f32 %v339_v49, %v1238_v10 }
  0x4d   : > { %v905_v60 = vpop.eup %904  ;;  %v554_v54 = vmul.f32 %v522_v23, %v298_v6  ;;  %v340_v36 = vmul.f32 %v1254_v19, %v1254_v19  ;;  %v239_v40 = vmul.f32 %v980_v0, %v200_v25  ;;  %v302_v45 = vmul.f32 0.5, %v1169_v43 }
  0x4e   : > { %v523_v33 = vadd.f32 1.0, %v905_v60  ;;  %v402_v21 = vmul.f32 0.044715, %v370_v27  ;;  %914 = vtanh.f32 %v464_v28  ;;  %v465_v42 = vmul.f32 0.7978846, %v433_v13  ;;  %v205_v60 = vld [vmem:[%s985_s20 + $0xf8] sm:$0xff] }
  0x4f   : > { %v848_v20 = vpack.c.bf16 %v554_v54, %v554_v54  ;;  %v403_v29 = vmul.f32 0.044715, %v371_v30  ;;  %v372_v50 = vmul.f32 %v340_v36, %v1254_v19  ;;  %v341_v53 = vmul.f32 %v1257_v56, %v1257_v56 }
  0x50   : > { %v907_v38 = vpop.eup %906  ;;  %v555_v44 = vmul.f32 %v523_v33, %v299_v32  ;;  %v434_v48 = vadd.f32 %v402_v21, %v1235_v37  ;;  %916 = vtanh.f32 %v465_v42  ;;  %v1275_v63 = vadd.f32 %v990_v1, %v239_v40 }
  0x51   : > { %v909_v51 = vpop.eup %908  ;;  %715 = vst.msk [vmem:[%s1115_s26 + $0x38] sm:$0xf] %vm700_vm0, %v848_v20  ;;  %v524_v34 = vadd.f32 1.0, %v907_v38  ;;  %v435_v11 = vadd.f32 %v403_v29, %v1238_v10  ;;  %v404_v58 = vmul.f32 0.044715, %v372_v50  ;;  %v373_v61 = vmul.f32 %v341_v53, %v1257_v56 }
  0x52   : > { %v849_v55 = vpack.c.bf16 %v555_v44, %v555_v44  ;;  %v525_v57 = vadd.f32 1.0, %v909_v51  ;;  %v466_v43 = vmul.f32 0.7978846, %v434_v48  ;;  %v240_v5 = vmul.f32 %v980_v0, %v201_v46 }
  0x53   : > { %v556_v59 = vmul.f32 %v524_v34, %v300_v16  ;;  %v467_v26 = vmul.f32 0.7978846, %v435_v11  ;;  %v911_v2 = vpop.eup %910  ;;  %v436_v4 = vadd.f32 %v404_v58, %v1254_v19  ;;  %v405_v8 = vmul.f32 0.044715, %v373_v61 }
  0x54   : > { %716 = vst.msk [vmem:[%s1115_s26 + $0x3c] sm:$0xf] %vm700_vm0, %v849_v55  ;;  %v557_v3 = vmul.f32 %v525_v57, %v301_v17  ;;  %918 = vtanh.f32 %v466_v43  ;;  %v526_v7 = vadd.f32 1.0, %v911_v2  ;;  %v303_v41 = vmul.f32 0.5, %v1197_v35 }
  0x55   : > { %v850_v6 = vpack.c.bf16 %v556_v59, %v556_v59  ;;  %920 = vtanh.f32 %v467_v26  ;;  %v468_v14 = vmul.f32 0.7978846, %v436_v4  ;;  %v342_v31 = vmul.f32 %v1275_v63, %v1275_v63 }
  0x56   : > { %v851_v32 = vpack.c.bf16 %v557_v3, %v557_v3  ;;  %v558_v15 = vmul.f32 %v526_v7, %v302_v45  ;;  %v437_v16 = vadd.f32 %v405_v8, %v1257_v56  ;;  %v1291_v17 = vadd.f32 %v990_v1, %v240_v5 }
  0x57   : > { %717 = vst.msk [vmem:[%s1115_s26 + $0x40] sm:$0xf] %vm700_vm0, %v850_v6  ;;  %v241_v47 = vmul.f32 %v980_v0, %v202_v18  ;;  %922 = vtanh.f32 %v468_v14  ;;  %v374_v35 = vmul.f32 %v342_v31, %v1275_v63  ;;  %v242_v22 = vmul.f32 %v980_v0, %v203_v9 }
  0x58   : > { %718 = vst.msk [vmem:[%s1115_s26 + $0x44] sm:$0xf] %vm700_vm0, %v851_v32  ;;  %v243_v23 = vmul.f32 %v980_v0, %v204_v12  ;;  %v913_v24 = vpop.eup %912  ;;  %v852_v39 = vpack.c.bf16 %v558_v15, %v558_v15  ;;  %v304_v49 = vmul.f32 0.5, %v1210_v52  ;;  %v469_v25 = vmul.f32 0.7978846, %v437_v16 }
  0x59   : > { %v343_v27 = vmul.f32 %v1291_v17, %v1291_v17  ;;  %v527_v54 = vadd.f32 1.0, %v913_v24  ;;  %v406_v28 = vmul.f32 0.044715, %v374_v35  ;;  %v1304_v13 = vadd.f32 %v990_v1, %v241_v47 }
  0x5a   : > { %v1307_v30 = vadd.f32 %v990_v1, %v242_v22  ;;  %719 = vst.msk [vmem:[%s1115_s26 + $0x48] sm:$0xf] %vm700_vm0, %v852_v39  ;;  %v305_v33 = vmul.f32 0.5, %v1219_v62  ;;  %924 = vtanh.f32 %v469_v25  ;;  %v1314_v21 = vadd.f32 %v990_v1, %v243_v23 }
  0x5b   : > { %v375_v52 = vmul.f32 %v343_v27, %v1291_v17  ;;  %v915_v36 = vpop.eup %914  ;;  %v559_v40 = vmul.f32 %v527_v54, %v303_v41  ;;  %v438_v20 = vadd.f32 %v406_v28, %v1275_v63  ;;  %v344_v42 = vmul.f32 %v1304_v13, %v1304_v13 }
  0x5c   : > { %v244_v29 = vmul.f32 %v980_v0, %v205_v60  ;;  %v528_v38 = vadd.f32 1.0, %v915_v36  ;;  %v306_v44 = vmul.f32 0.5, %v1235_v37  ;;  %v345_v45 = vmul.f32 %v1307_v30, %v1307_v30 }
  0x5d   : > { %v407_v62 = vmul.f32 0.044715, %v375_v52  ;;  %v917_v48 = vpop.eup %916  ;;  %v853_v50 = vpack.c.bf16 %v559_v40, %v559_v40  ;;  %v307_v51 = vmul.f32 0.5, %v1238_v10  ;;  %v470_v34 = vmul.f32 0.7978846, %v438_v20 }
  0x5e   : > { %v376_v11 = vmul.f32 %v344_v42, %v1304_v13  ;;  %v560_v53 = vmul.f32 %v528_v38, %v304_v49  ;;  %v529_v46 = vadd.f32 1.0, %v917_v48  ;;  %v377_v0 = vmul.f32 %v345_v45, %v1307_v30 }
  0x5f   : > { %v439_v55 = vadd.f32 %v407_v62, %v1291_v17  ;;  %720 = vst.msk [vmem:[%s1115_s26 + $0x4c] sm:$0xf] %vm700_vm0, %v853_v50  ;;  %926 = vtanh.f32 %v470_v34  ;;  %v346_v57 = vmul.f32 %v1314_v21, %v1314_v21  ;;  %v1332_v43 = vadd.f32 %v990_v1, %v244_v29 }
  0x60   : > { %v408_v37 = vmul.f32 0.044715, %v376_v11  ;;  %v854_v58 = vpack.c.bf16 %v560_v53, %v560_v53  ;;  %v561_v59 = vmul.f32 %v529_v46, %v305_v33  ;;  %v409_v61 = vmul.f32 0.044715, %v377_v0 }
  0x61   : > { %v919_v10 = vpop.eup %918  ;;  %v471_v26 = vmul.f32 0.7978846, %v439_v55  ;;  %v308_v4 = vmul.f32 0.5, %v1254_v19  ;;  %v378_v18 = vmul.f32 %v346_v57, %v1314_v21  ;;  %v347_v32 = vmul.f32 %v1332_v43, %v1332_v43 }
  0x62   : > { %v921_v2 = vpop.eup %920  ;;  %v530_v3 = vadd.f32 1.0, %v919_v10  ;;  %v440_v5 = vadd.f32 %v408_v37, %v1304_v13  ;;  %721 = vst.msk [vmem:[%s1115_s26 + $0x50] sm:$0xf] %vm700_vm0, %v854_v58  ;;  %v855_v6 = vpack.c.bf16 %v561_v59, %v561_v59  ;;  %v441_v1 = vadd.f32 %v409_v61, %v1307_v30 }
  0x63   : > { %v531_v7 = vadd.f32 1.0, %v921_v2  ;;  %928 = vtanh.f32 %v471_v26  ;;  %v410_v12 = vmul.f32 0.044715, %v378_v18  ;;  %v309_v35 = vmul.f32 0.5, %v1257_v56 }
  0x64   : > { %v562_v8 = vmul.f32 %v530_v3, %v306_v44  ;;  %v472_v9 = vmul.f32 0.7978846, %v440_v5  ;;  %v923_v41 = vpop.eup %922  ;;  %722 = vst.msk [vmem:[%s1115_s26 + $0x54] sm:$0xf] %vm700_vm0, %v855_v6  ;;  %v473_v14 = vmul.f32 0.7978846, %v441_v1  ;;  %v379_v22 = vmul.f32 %v347_v32, %v1332_v43 }
  0x65   : > { %v563_v19 = vmul.f32 %v531_v7, %v307_v51  ;;  %v532_v15 = vadd.f32 1.0, %v923_v41  ;;  %v442_v16 = vadd.f32 %v410_v12, %v1314_v21  ;;  %v310_v56 = vmul.f32 0.5, %v1275_v63 }
  0x66   : > { %v856_v31 = vpack.c.bf16 %v562_v8, %v562_v8  ;;  %930 = vtanh.f32 %v472_v9  ;;  %v411_v25 = vmul.f32 0.044715, %v379_v22  ;;  %v311_v40 = vmul.f32 0.5, %v1291_v17 }
  0x67   : > { %v857_v47 = vpack.c.bf16 %v563_v19, %v563_v19  ;;  %932 = vtanh.f32 %v473_v14  ;;  %v925_v23 = vpop.eup %924  ;;  %v564_v24 = vmul.f32 %v532_v15, %v308_v4  ;;  %v474_v39 = vmul.f32 0.7978846, %v442_v16 }
  0x68   : > { %723 = vst.msk [vmem:[%s1115_s26 + $0x58] sm:$0xf] %vm700_vm0, %v856_v31  ;;  %v533_v49 = vadd.f32 1.0, %v925_v23  ;;  %v443_v54 = vadd.f32 %v411_v25, %v1332_v43  ;;  %v312_v44 = vmul.f32 0.5, %v1304_v13  ;;  %v313_v45 = vmul.f32 0.5, %v1307_v30 }
  0x69   : > { %724 = vst.msk [vmem:[%s1115_s26 + $0x5c] sm:$0xf] %vm700_vm0, %v857_v47  ;;  %v858_v27 = vpack.c.bf16 %v564_v24, %v564_v24  ;;  %934 = vtanh.f32 %v474_v39  ;;  %v314_v11 = vmul.f32 0.5, %v1314_v21  ;;  %v315_v37 = vmul.f32 0.5, %v1332_v43 }
  0x6a   : > { %v565_v60 = vmul.f32 %v533_v49, %v309_v35  ;;  %v475_v52 = vmul.f32 0.7978846, %v443_v54 }
  0x6b   : > { %725 = vst.msk [vmem:[%s1115_s26 + $0x60] sm:$0xf] %vm700_vm0, %v858_v27 }
  0x6c   : > { %v927_v28 = vpop.eup %926  ;;  %v859_v33 = vpack.c.bf16 %v565_v60, %v565_v60  ;;  %936 = vtanh.f32 %v475_v52 }
  0x6d   : > { %v534_v36 = vadd.f32 1.0, %v927_v28 }
  0x6e   : > { %726 = vst.msk [vmem:[%s1115_s26 + $0x64] sm:$0xf] %vm700_vm0, %v859_v33 }
  0x6f   : > { %v566_v42 = vmul.f32 %v534_v36, %v310_v56 }
  0x70   : > { %v929_v20 = vpop.eup %928 }
  0x71   : > { %v535_v29 = vadd.f32 1.0, %v929_v20  ;;  %v860_v38 = vpack.c.bf16 %v566_v42, %v566_v42 }
  0x73   : > { %v931_v62 = vpop.eup %930  ;;  %v567_v63 = vmul.f32 %v535_v29, %v311_v40  ;;  %727 = vst.msk [vmem:[%s1115_s26 + $0x68] sm:$0xf] %vm700_vm0, %v860_v38 }
  0x74   : > { %v933_v48 = vpop.eup %932  ;;  %v536_v50 = vadd.f32 1.0, %v931_v62 }
  0x75   : > { %v861_v51 = vpack.c.bf16 %v567_v63, %v567_v63  ;;  %v537_v17 = vadd.f32 1.0, %v933_v48 }
  0x76   : > { %v568_v34 = vmul.f32 %v536_v50, %v312_v44  ;;  %v935_v53 = vpop.eup %934 }
  0x77   : > { %728 = vst.msk [vmem:[%s1115_s26 + $0x6c] sm:$0xf] %vm700_vm0, %v861_v51  ;;  %v569_v13 = vmul.f32 %v537_v17, %v313_v45  ;;  %v538_v55 = vadd.f32 1.0, %v935_v53 }
  0x78   : > { %v862_v46 = vpack.c.bf16 %v568_v34, %v568_v34 }
  0x79   : > { %v863_v0 = vpack.c.bf16 %v569_v13, %v569_v13  ;;  %v570_v30 = vmul.f32 %v538_v55, %v314_v11  ;;  %v937_v57 = vpop.eup %936 }
  0x7a   : > { %729 = vst.msk [vmem:[%s1115_s26 + $0x70] sm:$0xf] %vm700_vm0, %v862_v46  ;;  %v539_v58 = vadd.f32 1.0, %v937_v57 }
  0x7b   : > { %730 = vst.msk [vmem:[%s1115_s26 + $0x74] sm:$0xf] %vm700_vm0, %v863_v0  ;;  %v864_v10 = vpack.c.bf16 %v570_v30, %v570_v30 }
  0x7c   : > { %v571_v21 = vmul.f32 %v539_v58, %v315_v37 }
  0x7d   : > { %731 = vst.msk [vmem:[%s1115_s26 + $0x78] sm:$0xf] %vm700_vm0, %v864_v10 }
  0x7e   : > { %v865_v59 = vpack.c.bf16 %v571_v21, %v571_v21 }
  0x80   : > { %732 = vst.msk [vmem:[%s1115_s26 + $0x7c] sm:$0xf] %vm700_vm0, %v865_v59 }
  0x81 PF: > { %s13_s12 = sadd.s32 1, %s944_s12  }
  0x82   : > { %p10_p4 = scmp.ge.s32.totalorder %s13_s12, 4  }
  0x84   :  { %12 = sbr.rel (!%p10_p4) target bundleno = 1 (0x1), region = 62 }

// kernel: unet_down.4
= control target key start
LH: loop header
LB: loop body
LE: loop exit
PB: predicated region body
PF: predicated region fallthrough
CT: control target
= control target key end

     0   :  { %s1048_s15 = smov 0   ;;  %s1349_s0 = inlined_call_operand.vmem [shape: bf16[512,36], index: 0, kind: input, shape index: {}]   ;;  %s1350_s1 = inlined_call_operand.vmem [shape: bf16[36,8], index: 1, kind: input, shape index: {}]   ;;  %s1351_s2 = inlined_call_operand.vmem [shape: f32[512,8], index: 2, kind: output, shape index: {0}]   ;;  %s1352_s3 = inlined_call_operand.vmem [shape: f32[2,1,8], index: 3, kind: output, shape index: {1}]   ;;  %s1353_s4 = inlined_call_operand.vmem [shape: f32[2,1,8], index: 4, kind: output, shape index: {2}]  }
   0x1 LB: > { %s1054_s16 = sadd.s32 4294967295, %s1021_s15   ;;  %p881_p0 = scmp.ge.s32.totalorder %s1021_s15, 1  ;;  %s1021_s15 = sphi %s1048_s15, %s15_s15  }
   0x2   : > { %p168_p1 = scmp.lt.s32.totalorder %s1021_s15, 3 }
   0x4   : > { %p169_p2 = pnand %p881_p0, %p168_p1 }
   0x5   : > { %s882_s21 = sshll.u32 (!%p169_p2), %s1054_s16, 5  ;;  %p212_p4 = scmp.lt.s32.totalorder (!%p169_p2), %s1054_s16, 1 }
   0x6   : > { %172 = sbr.rel (%p169_p2) target bundleno = 301 (0x12d), region = 28  ;;  %p201_p3 = scmp.lt.s32.totalorder (!%p169_p2), %s882_s21, 63 }
   0xb   : > { %v996_v0 = vld [vmem:[%s1350_s1 + $0x10] ss:$0 sps:$4 sm:$0x33]   ;;  %vm400_vm0 = vcmask 1041408   ;;  %v997_v1 = vld [vmem:[%s1350_s1 + $0x8] sm:$0xff]   ;;  %v998_v3 = vld [vmem:[%s1350_s1] sm:$0xff]  }
   0xc   : > { %986 = vmatprep.subr.msk.bf16.mxu0 %vm400_vm0, %v996_v0  ;;  %v402_v2 = vsel %vm400_vm0, %v996_v0, 0  ;;  %987 = vmatprep.subr.msk.bf16.mxu1 %vm400_vm0, %v996_v0  ;;  %s1355_s21 = smov (!%p201_p3, %s882_s21), 63  ;;  %vm351_vm1 = vcmask 293888   ;;  %vm565_vm2 = vcmask 64512   ;;  %s1357_s16 = smov (!%p212_p4, %s1054_s16), 1  ;;  %vm667_vm3 = vcmask 57344  }
   0xd   : > { %943 = vmatpush3.bf16.msra.mxu0 %v402_v2  ;;  %983 = vmatpush3.bf16.msra.mxu1 %v402_v2  ;;  %s883_s24 = sshll.u32 %s1355_s21, 2  ;;  %s885_s28 = sshll.u32 %s1355_s21, 3 }
   0xe   : > { %944 = vmatprep.subr.bf16.mxu0 %v997_v1  ;;  %981 = vmatprep.subr.bf16.mxu1 %v997_v1  ;;  %s1074_s27 = scalar_lea.vmem %s1349_s0, %s883_s24  ;;  %s1112_s5 = scalar_lea.vmem %s1351_s2, %s885_s28 }
   0xf   : > { %v999_v4 = vld [vmem:[%s1074_s27] sm:$0xff]   ;;  %v1000_v5 = vld [vmem:[%s1074_s27 + $0x8] sm:$0xff]   ;;  %v1001_v6 = vld [vmem:[%s1074_s27 + $0x10] sm:$0xff]   ;;  %s214_s8 = scalar_lea.vmem %s1352_s3, %s1357_s16  ;;  %s217_s11 = scalar_lea.vmem %s1353_s4, %s1357_s16 }
  0x10   : > { %948 = vmatprep.mubr.msk.bf16.mxu0 %vm351_vm1, %v999_v4  ;;  %v1002_v7 = vld [vmem:[%s1074_s27 + $0x18] sm:$0xff]   ;;  %v1003_v8 = vld [vmem:[%s1074_s27 + $0x20] sm:$0xff]   ;;  %v1008_v10 = vld [vmem:[%s1074_s27 + $0x48] sm:$0xff]  }
  0x11   : > { %945 = vmatpush3.bf16.msra.mxu0 %v997_v1  ;;  %984 = vmatpush3.bf16.msra.mxu1 %v997_v1  ;;  %v1007_v9 = vld [vmem:[%s1074_s27 + $0x40] sm:$0xff]   ;;  %v1009_v11 = vld [vmem:[%s1074_s27 + $0x50] sm:$0xff]   ;;  %v1010_v12 = vld [vmem:[%s1074_s27 + $0x58] sm:$0xff]  }
  0x12   : > { %946 = vmatprep.subr.bf16.mxu0 %v998_v3  ;;  %982 = vmatprep.subr.bf16.mxu1 %v998_v3  ;;  %v1011_v13 = vld [vmem:[%s1074_s27 + $0x60] sm:$0xff]   ;;  %v1004_v14 = vld [vmem:[%s1074_s27 + $0x28] sm:$0xff]   ;;  %v1005_v15 = vld [vmem:[%s1074_s27 + $0x30] sm:$0xff]  }
  0x13   : > { %964 = vmatprep.mubr.msk.bf16.mxu1 %vm351_vm1, %v1007_v9  ;;  %v1012_v16 = vld [vmem:[%s1074_s27 + $0x68] sm:$0xff]   ;;  %v1013_v17 = vld [vmem:[%s1074_s27 + $0x70] sm:$0xff]   ;;  %v1006_v18 = vld [vmem:[%s1074_s27 + $0x38] sm:$0xff]  }
  0x14   : > { %v1014_v19 = vld [vmem:[%s1074_s27 + $0x78] sm:$0xff]  }
  0x15   : > { %947 = vmatpush3.bf16.msra.mxu0 %v998_v3  ;;  %985 = vmatpush3.bf16.msra.mxu1 %v998_v3 }
  0x18   : > { %949 = vmatmul.mubr.msk.bf16.vlgmr.msra.gmra.mxu0 %vm351_vm1, %v1000_v5  ;;  %965 = vmatmul.mubr.msk.bf16.vlgmr.msra.gmra.mxu1 %vm351_vm1, %v1008_v10 }
  0x19   : > { %952 = vmatprep.mubr.msk.bf16.mxu0 %vm351_vm1, %v1001_v6  ;;  %968 = vmatprep.mubr.msk.bf16.mxu1 %vm351_vm1, %v1009_v11 }
  0x20   : > { %953 = vmatmul.mubr.msk.bf16.gmra.mxu0 %vm351_vm1, %v1002_v7  ;;  %969 = vmatmul.mubr.msk.bf16.gmra.mxu1 %vm351_vm1, %v1010_v12 }
  0x21   : > { %956 = vmatprep.mubr.msk.bf16.mxu0 %vm351_vm1, %v1003_v8  ;;  %972 = vmatprep.mubr.msk.bf16.mxu1 %vm351_vm1, %v1011_v13 }
  0x28   : > { %957 = vmatmul.mubr.msk.bf16.gmra.mxu0 %vm351_vm1, %v1004_v14  ;;  %973 = vmatmul.mubr.msk.bf16.gmra.mxu1 %vm351_vm1, %v1012_v16 }
  0x29   : > { %960 = vmatprep.mubr.msk.bf16.mxu0 %vm351_vm1, %v1005_v15  ;;  %976 = vmatprep.mubr.msk.bf16.mxu1 %vm351_vm1, %v1013_v17 }
  0x30   : > { %961 = vmatmul.mubr.msk.bf16.gmra.mxu0 %vm351_vm1, %v1006_v18  ;;  %977 = vmatmul.mubr.msk.bf16.gmra.mxu1 %vm351_vm1, %v1014_v19 }
  0xd8   : > { %v950_v20 = vpop.f32.mrf.mxu0  ;;  %v1120_v25 = vpop.f32.mrf.mxu1 }
  0xd9   : > { %568 = vst.msk [vmem:[%s1112_s5 + $0x10] sm:$0xff] %vm565_vm2, %v950_v20  ;;  %v671_v26 = vmul.f32 %v950_v20, %v950_v20  ;;  %584 = vst.msk [vmem:[%s1112_s5 + $0x90] sm:$0xff] %vm565_vm2, %v1120_v25  ;;  %v601_v33 = vsel %vm565_vm2, %v950_v20, 0.0 }
  0xda   : > { %v438_v21 = vpop.f32.mrf.mxu0  ;;  %v1129_v32 = vpop.f32.mrf.mxu1 }
  0xdb   : > { %566 = vst.msk [vmem:[%s1112_s5] sm:$0xff] %vm565_vm2, %v438_v21  ;;  %v669_v23 = vmul.f32 %v438_v21, %v438_v21  ;;  %v598_v27 = vsel %vm565_vm2, %v438_v21, 0.0  ;;  %582 = vst.msk [vmem:[%s1112_s5 + $0x80] sm:$0xff] %vm565_vm2, %v1129_v32  ;;  %v704_v41 = vsel %vm565_vm2, %v671_v26, 0.0 }
  0xdc   : > { %v951_v22 = vpop.f32.mrf.mxu0  ;;  %v1139_v40 = vpop.f32.mrf.mxu1 }
  0xdd   : > { %569 = vst.msk [vmem:[%s1112_s5 + $0x18] sm:$0xff] %vm565_vm2, %v951_v22  ;;  %v701_v34 = vsel %vm565_vm2, %v669_v23, 0.0  ;;  %v672_v35 = vmul.f32 %v951_v22, %v951_v22  ;;  %v603_v42 = vsel %vm565_vm2, %v951_v22, 0.0  ;;  %585 = vst.msk [vmem:[%s1112_s5 + $0x98] sm:$0xff] %vm565_vm2, %v1139_v40 }
  0xde   : > { %v441_v24 = vpop.f32.mrf.mxu0  ;;  %v1148_v47 = vpop.f32.mrf.mxu1 }
  0xdf   : > { %567 = vst.msk [vmem:[%s1112_s5 + $0x8] sm:$0xff] %vm565_vm2, %v441_v24  ;;  %v599_v28 = vsel %vm565_vm2, %v441_v24, 0.0  ;;  %v670_v29 = vmul.f32 %v441_v24, %v441_v24  ;;  %v706_v48 = vsel %vm565_vm2, %v672_v35, 0.0  ;;  %583 = vst.msk [vmem:[%s1112_s5 + $0x88] sm:$0xff] %vm565_vm2, %v1148_v47 }
  0xe0   : > { %v600_v30 = vadd.f32 %v599_v28, %v598_v27  ;;  %v954_v31 = vpop.f32.mrf.mxu0  ;;  %v1157_v53 = vpop.f32.mrf.mxu1 }
  0xe1   : > { %v702_v36 = vsel %vm565_vm2, %v670_v29, 0.0  ;;  %572 = vst.msk [vmem:[%s1112_s5 + $0x30] sm:$0xff] %vm565_vm2, %v954_v31  ;;  %v675_v54 = vmul.f32 %v954_v31, %v954_v31  ;;  %588 = vst.msk [vmem:[%s1112_s5 + $0xb0] sm:$0xff] %vm565_vm2, %v1157_v53  ;;  %v609_v62 = vsel %vm565_vm2, %v954_v31, 0.0 }
  0xe2   : > { %v602_v37 = vadd.f32 %v601_v33, %v600_v30  ;;  %v703_v38 = vadd.f32 %v702_v36, %v701_v34  ;;  %v454_v39 = vpop.f32.mrf.mxu0  ;;  %v1166_v61 = vpop.f32.mrf.mxu1 }
  0xe3   : > { %570 = vst.msk [vmem:[%s1112_s5 + $0x20] sm:$0xff] %vm565_vm2, %v454_v39  ;;  %v673_v43 = vmul.f32 %v454_v39, %v454_v39  ;;  %v605_v49 = vsel %vm565_vm2, %v454_v39, 0.0  ;;  %586 = vst.msk [vmem:[%s1112_s5 + $0xa0] sm:$0xff] %vm565_vm2, %v1166_v61  ;;  %v712_v5 = vsel %vm565_vm2, %v675_v54, 0.0 }
  0xe4   : > { %v705_v44 = vadd.f32 %v704_v41, %v703_v38  ;;  %v604_v45 = vadd.f32 %v603_v42, %v602_v37  ;;  %v955_v46 = vpop.f32.mrf.mxu0  ;;  %v1175_v4 = vpop.f32.mrf.mxu1 }
  0xe5   : > { %573 = vst.msk [vmem:[%s1112_s5 + $0x38] sm:$0xff] %vm565_vm2, %v955_v46  ;;  %v708_v55 = vsel %vm565_vm2, %v673_v43, 0.0  ;;  %v676_v63 = vmul.f32 %v955_v46, %v955_v46  ;;  %v611_v6 = vsel %vm565_vm2, %v955_v46, 0.0  ;;  %589 = vst.msk [vmem:[%s1112_s5 + $0xb8] sm:$0xff] %vm565_vm2, %v1175_v4 }
  0xe6   : > { %v606_v50 = vadd.f32 %v605_v49, %v604_v45  ;;  %v707_v51 = vadd.f32 %v706_v48, %v705_v44  ;;  %v457_v52 = vpop.f32.mrf.mxu0  ;;  %v1184_v11 = vpop.f32.mrf.mxu1 }
  0xe7   : > { %571 = vst.msk [vmem:[%s1112_s5 + $0x28] sm:$0xff] %vm565_vm2, %v457_v52  ;;  %v607_v56 = vsel %vm565_vm2, %v457_v52, 0.0  ;;  %v674_v57 = vmul.f32 %v457_v52, %v457_v52  ;;  %v714_v12 = vsel %vm565_vm2, %v676_v63, 0.0  ;;  %587 = vst.msk [vmem:[%s1112_s5 + $0xa8] sm:$0xff] %vm565_vm2, %v1184_v11 }
  0xe8   : > { %v709_v58 = vadd.f32 %v708_v55, %v707_v51  ;;  %v608_v59 = vadd.f32 %v607_v56, %v606_v50  ;;  %v958_v60 = vpop.f32.mrf.mxu0  ;;  %v1193_v17 = vpop.f32.mrf.mxu1 }
  0xe9   : > { %v710_v0 = vsel %vm565_vm2, %v674_v57, 0.0  ;;  %576 = vst.msk [vmem:[%s1112_s5 + $0x50] sm:$0xff] %vm565_vm2, %v958_v60  ;;  %v679_v18 = vmul.f32 %v958_v60, %v958_v60  ;;  %592 = vst.msk [vmem:[%s1112_s5 + $0xd0] sm:$0xff] %vm565_vm2, %v1193_v17  ;;  %v617_v27 = vsel %vm565_vm2, %v958_v60, 0.0 }
  0xea   : > { %v610_v1 = vadd.f32 %v609_v62, %v608_v59  ;;  %v711_v2 = vadd.f32 %v710_v0, %v709_v58  ;;  %v470_v3 = vpop.f32.mrf.mxu0  ;;  %v1202_v26 = vpop.f32.mrf.mxu1 }
  0xeb   : > { %574 = vst.msk [vmem:[%s1112_s5 + $0x40] sm:$0xff] %vm565_vm2, %v470_v3  ;;  %v677_v7 = vmul.f32 %v470_v3, %v470_v3  ;;  %v613_v13 = vsel %vm565_vm2, %v470_v3, 0.0  ;;  %590 = vst.msk [vmem:[%s1112_s5 + $0xc0] sm:$0xff] %vm565_vm2, %v1202_v26  ;;  %v720_v35 = vsel %vm565_vm2, %v679_v18, 0.0  ;;  %v685_v3 = vmul.f32 %v1129_v32, %v1129_v32 }
  0xec   : > { %v713_v8 = vadd.f32 %v712_v5, %v711_v2  ;;  %v612_v9 = vadd.f32 %v611_v6, %v610_v1  ;;  %v959_v10 = vpop.f32.mrf.mxu0  ;;  %v1211_v34 = vpop.f32.mrf.mxu1 }
  0xed   : > { %577 = vst.msk [vmem:[%s1112_s5 + $0x58] sm:$0xff] %vm565_vm2, %v959_v10  ;;  %v716_v19 = vsel %vm565_vm2, %v677_v7, 0.0  ;;  %v680_v28 = vmul.f32 %v959_v10, %v959_v10  ;;  %v619_v36 = vsel %vm565_vm2, %v959_v10, 0.0  ;;  %593 = vst.msk [vmem:[%s1112_s5 + $0xd8] sm:$0xff] %vm565_vm2, %v1211_v34  ;;  %v686_v10 = vmul.f32 %v1148_v47, %v1148_v47 }
  0xee   : > { %v614_v14 = vadd.f32 %v613_v13, %v612_v9  ;;  %v715_v15 = vadd.f32 %v714_v12, %v713_v8  ;;  %v473_v16 = vpop.f32.mrf.mxu0  ;;  %v1220_v42 = vpop.f32.mrf.mxu1  ;;  %v629_v9 = vsel %vm565_vm2, %v1129_v32, 0.0  ;;  %v633_v32 = vsel %vm565_vm2, %v1120_v25, 0.0 }
  0xef   : > { %575 = vst.msk [vmem:[%s1112_s5 + $0x48] sm:$0xff] %vm565_vm2, %v473_v16  ;;  %v615_v20 = vsel %vm565_vm2, %v473_v16, 0.0  ;;  %v678_v21 = vmul.f32 %v473_v16, %v473_v16  ;;  %v722_v43 = vsel %vm565_vm2, %v680_v28, 0.0  ;;  %591 = vst.msk [vmem:[%s1112_s5 + $0xc8] sm:$0xff] %vm565_vm2, %v1220_v42  ;;  %v631_v16 = vsel %vm565_vm2, %v1148_v47, 0.0 }
  0xf0   : > { %v717_v22 = vadd.f32 %v716_v19, %v715_v15  ;;  %v616_v23 = vadd.f32 %v615_v20, %v614_v14  ;;  %v962_v24 = vpop.f32.mrf.mxu0  ;;  %v1229_v49 = vpop.f32.mrf.mxu1  ;;  %v687_v14 = vmul.f32 %v1120_v25, %v1120_v25  ;;  %v732_v15 = vsel %vm565_vm2, %v685_v3, 0.0 }
  0xf1   : > { %v718_v29 = vsel %vm565_vm2, %v678_v21, 0.0  ;;  %580 = vst.msk [vmem:[%s1112_s5 + $0x70] sm:$0xff] %vm565_vm2, %v962_v24  ;;  %v683_v50 = vmul.f32 %v962_v24, %v962_v24  ;;  %596 = vst.msk [vmem:[%s1112_s5 + $0xf0] sm:$0xff] %vm565_vm2, %v1229_v49  ;;  %v625_v58 = vsel %vm565_vm2, %v962_v24, 0.0  ;;  %v688_v20 = vmul.f32 %v1139_v40, %v1139_v40 }
  0xf2   : > { %v618_v30 = vadd.f32 %v617_v27, %v616_v23  ;;  %v719_v31 = vadd.f32 %v718_v29, %v717_v22  ;;  %v486_v33 = vpop.f32.mrf.mxu0  ;;  %v1238_v57 = vpop.f32.mrf.mxu1  ;;  %v734_v21 = vsel %vm565_vm2, %v686_v10, 0.0  ;;  %v736_v24 = vsel %vm565_vm2, %v687_v14, 0.0 }
  0xf3   : > { %578 = vst.msk [vmem:[%s1112_s5 + $0x60] sm:$0xff] %vm565_vm2, %v486_v33  ;;  %v681_v37 = vmul.f32 %v486_v33, %v486_v33  ;;  %v621_v44 = vsel %vm565_vm2, %v486_v33, 0.0  ;;  %594 = vst.msk [vmem:[%s1112_s5 + $0xe0] sm:$0xff] %vm565_vm2, %v1238_v57  ;;  %v728_v1 = vsel %vm565_vm2, %v683_v50, 0.0  ;;  %v635_v27 = vsel %vm565_vm2, %v1139_v40, 0.0 }
  0xf4   : > { %v721_v38 = vadd.f32 %v720_v35, %v719_v31  ;;  %v620_v39 = vadd.f32 %v619_v36, %v618_v30  ;;  %v963_v41 = vpop.f32.mrf.mxu0  ;;  %v1245_v0 = vpop.f32.mrf.mxu1  ;;  %v689_v47 = vmul.f32 %v1166_v61, %v1166_v61  ;;  %v738_v30 = vsel %vm565_vm2, %v688_v20, 0.0 }
  0xf5   : > { %581 = vst.msk [vmem:[%s1112_s5 + $0x78] sm:$0xff] %vm565_vm2, %v963_v41  ;;  %v724_v51 = vsel %vm565_vm2, %v681_v37, 0.0  ;;  %v684_v59 = vmul.f32 %v963_v41, %v963_v41  ;;  %v627_v2 = vsel %vm565_vm2, %v963_v41, 0.0  ;;  %597 = vst.msk [vmem:[%s1112_s5 + $0xf8] sm:$0xff] %vm565_vm2, %v1245_v0  ;;  %v637_v25 = vsel %vm565_vm2, %v1166_v61, 0.0 }
  0xf6   : > { %v622_v45 = vadd.f32 %v621_v44, %v620_v39  ;;  %v723_v46 = vadd.f32 %v722_v43, %v721_v38  ;;  %v489_v48 = vpop.f32.mrf.mxu0  ;;  %v1254_v7 = vpop.f32.mrf.mxu1  ;;  %v690_v31 = vmul.f32 %v1184_v11, %v1184_v11  ;;  %v691_v36 = vmul.f32 %v1157_v53, %v1157_v53 }
  0xf7   : > { %579 = vst.msk [vmem:[%s1112_s5 + $0x68] sm:$0xff] %vm565_vm2, %v489_v48  ;;  %v623_v52 = vsel %vm565_vm2, %v489_v48, 0.0  ;;  %v682_v54 = vmul.f32 %v489_v48, %v489_v48  ;;  %v730_v8 = vsel %vm565_vm2, %v684_v59, 0.0  ;;  %595 = vst.msk [vmem:[%s1112_s5 + $0xe8] sm:$0xff] %vm565_vm2, %v1254_v7  ;;  %v740_v40 = vsel %vm565_vm2, %v689_v47, 0.0 }
  0xf8   : > { %v725_v55 = vadd.f32 %v724_v51, %v723_v46  ;;  %v624_v56 = vadd.f32 %v623_v52, %v622_v45  ;;  %v639_v37 = vsel %vm565_vm2, %v1184_v11, 0.0  ;;  %v641_v41 = vsel %vm565_vm2, %v1157_v53, 0.0 }
  0xf9   : > { %v726_v60 = vsel %vm565_vm2, %v682_v54, 0.0  ;;  %v692_v61 = vmul.f32 %v1175_v4, %v1175_v4  ;;  %v742_v43 = vsel %vm565_vm2, %v690_v31, 0.0  ;;  %v744_v46 = vsel %vm565_vm2, %v691_v36, 0.0 }
  0xfa   : > { %v626_v62 = vadd.f32 %v625_v58, %v624_v56  ;;  %v727_v63 = vadd.f32 %v726_v60, %v725_v55  ;;  %v643_v48 = vsel %vm565_vm2, %v1175_v4, 0.0  ;;  %v693_v11 = vmul.f32 %v1202_v26, %v1202_v26 }
  0xfb   : > { %v746_v52 = vsel %vm565_vm2, %v692_v61, 0.0  ;;  %v645_v53 = vsel %vm565_vm2, %v1202_v26, 0.0  ;;  %v694_v54 = vmul.f32 %v1220_v42, %v1220_v42  ;;  %v695_v58 = vmul.f32 %v1193_v17, %v1193_v17 }
  0xfc   : > { %v628_v5 = vadd.f32 %v627_v2, %v626_v62  ;;  %v729_v6 = vadd.f32 %v728_v1, %v727_v63  ;;  %v748_v4 = vsel %vm565_vm2, %v693_v11, 0.0  ;;  %v647_v59 = vsel %vm565_vm2, %v1220_v42, 0.0 }
  0xfd   : > { %v649_v63 = vsel %vm565_vm2, %v1193_v17, 0.0  ;;  %v696_v26 = vmul.f32 %v1211_v34, %v1211_v34  ;;  %v750_v1 = vsel %vm565_vm2, %v694_v54, 0.0  ;;  %v697_v42 = vmul.f32 %v1238_v57, %v1238_v57 }
  0xfe   : > { %v731_v12 = vadd.f32 %v730_v8, %v729_v6  ;;  %v630_v13 = vadd.f32 %v629_v9, %v628_v5  ;;  %v752_v5 = vsel %vm565_vm2, %v695_v58, 0.0  ;;  %v651_v6 = vsel %vm565_vm2, %v1211_v34, 0.0 }
  0xff   : > { %v754_v10 = vsel %vm565_vm2, %v696_v26, 0.0  ;;  %v653_v17 = vsel %vm565_vm2, %v1238_v57, 0.0  ;;  %v756_v34 = vsel %vm565_vm2, %v697_v42, 0.0  ;;  %v700_v57 = vmul.f32 %v1245_v0, %v1245_v0 }
 0x100   : > { %v632_v18 = vadd.f32 %v631_v16, %v630_v13  ;;  %v733_v19 = vadd.f32 %v732_v15, %v731_v12  ;;  %v698_v12 = vmul.f32 %v1254_v7, %v1254_v7  ;;  %v699_v15 = vmul.f32 %v1229_v49, %v1229_v49 }
 0x101   : > { %v655_v16 = vsel %vm565_vm2, %v1254_v7, 0.0  ;;  %v762_v47 = vsel %vm565_vm2, %v700_v57, 0.0 }
 0x102   : > { %v634_v22 = vadd.f32 %v633_v32, %v632_v18  ;;  %v735_v23 = vadd.f32 %v734_v21, %v733_v19  ;;  %v657_v32 = vsel %vm565_vm2, %v1229_v49, 0.0  ;;  %v758_v20 = vsel %vm565_vm2, %v698_v12, 0.0 }
 0x104   : > { %v737_v28 = vadd.f32 %v736_v24, %v735_v23  ;;  %v636_v29 = vadd.f32 %v635_v27, %v634_v22  ;;  %v760_v23 = vsel %vm565_vm2, %v699_v15, 0.0  ;;  %v659_v24 = vsel %vm565_vm2, %v1245_v0, 0.0 }
 0x106   : > { %v638_v33 = vadd.f32 %v637_v25, %v636_v29  ;;  %v739_v35 = vadd.f32 %v738_v30, %v737_v28 }
 0x108   : > { %v741_v38 = vadd.f32 %v740_v40, %v739_v35  ;;  %v640_v39 = vadd.f32 %v639_v37, %v638_v33 }
 0x10a   : > { %v642_v44 = vadd.f32 %v641_v41, %v640_v39  ;;  %v743_v45 = vadd.f32 %v742_v43, %v741_v38 }
 0x10c   : > { %v745_v50 = vadd.f32 %v744_v46, %v743_v45  ;;  %v644_v51 = vadd.f32 %v643_v48, %v642_v44 }
 0x10e   : > { %v646_v55 = vadd.f32 %v645_v53, %v644_v51  ;;  %v747_v56 = vadd.f32 %v746_v52, %v745_v50 }
 0x110   : > { %v749_v60 = vadd.f32 %v748_v4, %v747_v56  ;;  %v648_v62 = vadd.f32 %v647_v59, %v646_v55 }
 0x112   : > { %v650_v2 = vadd.f32 %v649_v63, %v648_v62  ;;  %v751_v3 = vadd.f32 %v750_v1, %v749_v60 }
 0x114   : > { %v753_v8 = vadd.f32 %v752_v5, %v751_v3  ;;  %v652_v9 = vadd.f32 %v651_v6, %v650_v2 }
 0x116   : > { %v654_v13 = vadd.f32 %v653_v17, %v652_v9  ;;  %v755_v14 = vadd.f32 %v754_v10, %v753_v8 }
 0x118   : > { %v757_v18 = vadd.f32 %v756_v34, %v755_v14  ;;  %v656_v19 = vadd.f32 %v655_v16, %v654_v13 }
 0x11a   : > { %v658_v21 = vadd.f32 %v657_v32, %v656_v19  ;;  %v759_v22 = vadd.f32 %v758_v20, %v757_v18 }
 0x11c   : > { %v660_v27 = vadd.f32 %v659_v24, %v658_v21  ;;  %v761_v7 = vadd.f32 %v760_v23, %v759_v22 }
 0x11e   : > { %v661_v28 = vrot.slane %v660_v27, 4  ;;  %v763_v29 = vadd.f32 %v762_v47, %v761_v7 }
 0x120   : > { %v662_v49 = vadd.f32 %v661_v28, %v660_v27  ;;  %v764_v30 = vrot.slane %v763_v29, 4 }
 0x122   : > { %v663_v25 = vrot.slane %v662_v49, 2  ;;  %v765_v31 = vadd.f32 %v764_v30, %v763_v29 }
 0x124   : > { %v664_v33 = vadd.f32 %v663_v25, %v662_v49  ;;  %v766_v35 = vrot.slane %v765_v31, 2 }
 0x126   : > { %v665_v36 = vrot.slane %v664_v33, 1  ;;  %v767_v40 = vadd.f32 %v766_v35, %v765_v31 }
 0x128   : > { %v666_v0 = vadd.f32 %v665_v36, %v664_v33  ;;  %v768_v37 = vrot.slane %v767_v40, 1 }
 0x12a   : > { %668 = vst.msk [vmem:[%s214_s8] sm:$0x1] %vm667_vm3, %v666_v0  ;;  %v769_v38 = vadd.f32 %v768_v37, %v767_v40 }
 0x12c   : > { %770 = vst.msk [vmem:[%s217_s11] sm:$0x1] %vm667_vm3, %v769_v38 }
 0x12d PF: > { %s15_s15 = sadd.s32 1, %s1021_s15  }
 0x12e   : > { %p12_p5 = scmp.ge.s32.totalorder %s15_s15, 4  }
 0x130   :  { %14 = sbr.rel (!%p12_p5) target bundleno = 1 (0x1), region = 82 }

// kernel: unet_down.7
= control target key start
LH: loop header
LB: loop body
LE: loop exit
PB: predicated region body
PF: predicated region fallthrough
CT: control target
= control target key end

     0   :  { %s1009_s12 = smov 0   ;;  %s1011_s13 = smov 0   ;;  %s1459_s0 = inlined_call_operand.vmem [shape: f32[2,16,16,8], index: 0, kind: input, shape index: {}]   ;;  %s1460_s1 = inlined_call_operand.vmem [shape: f32[1,8], index: 1, kind: input, shape index: {}]   ;;  %s1461_s2 = inlined_call_operand.vmem [shape: f32[1,8], index: 2, kind: input, shape index: {}]   ;;  %s1462_s3 = inlined_call_operand.vmem [shape: f32[2,8,8,8], index: 3, kind: output, shape index: {}]  }
   0x1   :  { %s1013_s14 = smov 0  }
   0x2 LB: > { %s25_s15 = sadd.s32 1, %s983_s13  ;;  %p866_p0 = scmp.ge.s32.totalorder %s987_s14, 1  ;;  %s987_s14 = sphi %s1013_s14, %s13_s14   ;;  %s983_s13 = sphi %s1011_s13, %s1464_s13   ;;  %s979_s12 = sphi %s1009_s12, %s1463_s12  }
   0x3   : > { %p27_p1 = scmp.ge.s32.totalorder %s25_s15, 2  ;;  %p159_p2 = scmp.lt.s32.totalorder %s987_s14, 3 }
   0x5   : > { %s1466_s15 = smov (%p27_p1, %s25_s15), 0  ;;  %p160_p3 = pnand %p866_p0, %p159_p2 }
   0x6   : > { %p193_p4 = scmp.lt.s32.totalorder (!%p160_p3), %s979_s12, 1 }
   0x7   : > { %163 = sbr.rel (%p160_p3) target bundleno = 143 (0x8f), region = 32 }
   0xc   : > { %s1468_s12 = smov (!%p193_p4, %s979_s12), 1  ;;  %v1033_v0 = vld [vmem:[%s1460_s1] ss:$0 sm:$0xff]  ;;  %vm611_vm0 = vcmask 64512  }
   0xd   : > { %s875_s16 = sshll.u32 %s1468_s12, 8  ;;  %v1043_v1 = vld [vmem:[%s1461_s2] ss:$0 sm:$0xff]  ;;  %s876_s24 = sshll.u32 %s1468_s12, 6 }
   0xe   : > { %s1038_s21 = scalar_lea.vmem %s1459_s0, %s875_s16  ;;  %s1407_s27 = scalar_lea.vmem %s1462_s3, %s876_s24 }
   0xf   : > { %v213_v2 = vld [vmem:[%s1038_s21] sm:$0xff]  ;;  %v214_v3 = vld [vmem:[%s1038_s21 + $0x8] sm:$0xff]  ;;  %v215_v4 = vld [vmem:[%s1038_s21 + $0x10] sm:$0xff] }
  0x10   : > { %v252_v5 = vmul.f32 %v1033_v0, %v213_v2  ;;  %v253_v6 = vmul.f32 %v1033_v0, %v214_v3  ;;  %v254_v7 = vmul.f32 %v1033_v0, %v215_v4  ;;  %v216_v8 = vld [vmem:[%s1038_s21 + $0x18] sm:$0xff]  ;;  %v217_v9 = vld [vmem:[%s1038_s21 + $0x20] sm:$0xff]  ;;  %v218_v10 = vld [vmem:[%s1038_s21 + $0x28] sm:$0xff] }
  0x11   : > { %v255_v11 = vmul.f32 %v1033_v0, %v216_v8  ;;  %v256_v12 = vmul.f32 %v1033_v0, %v217_v9  ;;  %v257_v13 = vmul.f32 %v1033_v0, %v218_v10  ;;  %v219_v14 = vld [vmem:[%s1038_s21 + $0x30] sm:$0xff]  ;;  %v220_v21 = vld [vmem:[%s1038_s21 + $0x38] sm:$0xff]  ;;  %v221_v50 = vld [vmem:[%s1038_s21 + $0x40] sm:$0xff] }
  0x12   : > { %v291_v15 = vadd.f32 %v1043_v1, %v252_v5  ;;  %v292_v16 = vadd.f32 %v1043_v1, %v253_v6  ;;  %v293_v17 = vadd.f32 %v1043_v1, %v254_v7  ;;  %v258_v24 = vmul.f32 %v1033_v0, %v219_v14  ;;  %v222_v55 = vld [vmem:[%s1038_s21 + $0x48] sm:$0xff]  ;;  %v223_v60 = vld [vmem:[%s1038_s21 + $0x50] sm:$0xff]  ;;  %v224_v2 = vld [vmem:[%s1038_s21 + $0x58] sm:$0xff] }
  0x13   : > { %v1062_v18 = vadd.f32 %v1043_v1, %v255_v11  ;;  %v1065_v19 = vadd.f32 %v1043_v1, %v256_v12  ;;  %v1068_v20 = vadd.f32 %v1043_v1, %v257_v13  ;;  %v259_v30 = vmul.f32 %v1033_v0, %v220_v21 }
  0x14   : > { %v355_v22 = vmul.f32 %v291_v15, %v291_v15  ;;  %v356_v23 = vmul.f32 %v292_v16, %v292_v16  ;;  %v357_v25 = vmul.f32 %v293_v17, %v293_v17  ;;  %v1082_v37 = vadd.f32 %v1043_v1, %v258_v24 }
  0x15   : > { %v358_v26 = vmul.f32 %v1062_v18, %v1062_v18  ;;  %v359_v29 = vmul.f32 %v1065_v19, %v1065_v19  ;;  %v360_v33 = vmul.f32 %v1068_v20, %v1068_v20  ;;  %v1084_v38 = vmul.f32 0.5, %v291_v15 }
  0x16   : > { %v387_v27 = vmul.f32 %v355_v22, %v291_v15  ;;  %v388_v28 = vmul.f32 %v356_v23, %v292_v16  ;;  %v389_v31 = vmul.f32 %v357_v25, %v293_v17  ;;  %v1088_v45 = vadd.f32 %v1043_v1, %v259_v30 }
  0x17   : > { %v390_v32 = vmul.f32 %v358_v26, %v1062_v18  ;;  %v391_v36 = vmul.f32 %v359_v29, %v1065_v19  ;;  %v392_v41 = vmul.f32 %v360_v33, %v1068_v20  ;;  %v361_v49 = vmul.f32 %v1082_v37, %v1082_v37 }
  0x18   : > { %v419_v34 = vmul.f32 0.044715, %v387_v27  ;;  %v420_v35 = vmul.f32 0.044715, %v388_v28  ;;  %v421_v39 = vmul.f32 0.044715, %v389_v31  ;;  %v362_v62 = vmul.f32 %v1088_v45, %v1088_v45 }
  0x19   : > { %v422_v40 = vmul.f32 0.044715, %v390_v32  ;;  %v423_v44 = vmul.f32 0.044715, %v391_v36  ;;  %v424_v48 = vmul.f32 0.044715, %v392_v41  ;;  %v393_v59 = vmul.f32 %v361_v49, %v1082_v37 }
  0x1a   : > { %v451_v42 = vadd.f32 %v419_v34, %v291_v15  ;;  %v452_v43 = vadd.f32 %v420_v35, %v292_v16  ;;  %v453_v46 = vadd.f32 %v421_v39, %v293_v17  ;;  %v1094_v52 = vmul.f32 0.5, %v292_v16  ;;  %v225_v15 = vld [vmem:[%s1038_s21 + $0x60] sm:$0xff]  ;;  %v226_v16 = vld [vmem:[%s1038_s21 + $0x68] sm:$0xff]  ;;  %v227_v41 = vld [vmem:[%s1038_s21 + $0x70] sm:$0xff] }
  0x1b   : > { %v454_v47 = vadd.f32 %v422_v40, %v1062_v18  ;;  %v455_v54 = vadd.f32 %v423_v44, %v1065_v19  ;;  %v456_v58 = vadd.f32 %v424_v48, %v1068_v20  ;;  %v260_v63 = vmul.f32 %v1033_v0, %v221_v50 }
  0x1c   : > { %v483_v51 = vmul.f32 0.7978846, %v451_v42  ;;  %v484_v53 = vmul.f32 0.7978846, %v452_v43  ;;  %v485_v56 = vmul.f32 0.7978846, %v453_v46  ;;  %v261_v5 = vmul.f32 %v1033_v0, %v222_v55 }
  0x1d   : > { %v486_v57 = vmul.f32 0.7978846, %v454_v47  ;;  %v487_v61 = vmul.f32 0.7978846, %v455_v54  ;;  %v488_v3 = vmul.f32 0.7978846, %v456_v58  ;;  %v394_v6 = vmul.f32 %v362_v62, %v1088_v45 }
  0x1e   : > { %901 = vtanh.f32 %v483_v51  ;;  %v425_v4 = vmul.f32 0.044715, %v393_v59  ;;  %v1108_v7 = vadd.f32 %v1043_v1, %v260_v63  ;;  %v262_v8 = vmul.f32 %v1033_v0, %v223_v60 }
  0x1f   : > { %903 = vtanh.f32 %v484_v53  ;;  %v1113_v10 = vadd.f32 %v1043_v1, %v261_v5  ;;  %v263_v11 = vmul.f32 %v1033_v0, %v224_v2  ;;  %v1116_v12 = vmul.f32 0.5, %v293_v17 }
  0x20   : > { %905 = vtanh.f32 %v485_v56  ;;  %v457_v9 = vadd.f32 %v425_v4, %v1082_v37  ;;  %v426_v13 = vmul.f32 0.044715, %v394_v6  ;;  %v363_v14 = vmul.f32 %v1108_v7, %v1108_v7 }
  0x21   : > { %907 = vtanh.f32 %v486_v57  ;;  %v1123_v21 = vmul.f32 0.5, %v1062_v18  ;;  %v364_v23 = vmul.f32 %v1113_v10, %v1113_v10  ;;  %v1130_v25 = vadd.f32 %v1043_v1, %v262_v8 }
  0x22   : > { %909 = vtanh.f32 %v487_v61  ;;  %v489_v22 = vmul.f32 0.7978846, %v457_v9  ;;  %v458_v24 = vadd.f32 %v426_v13, %v1088_v45  ;;  %v395_v17 = vmul.f32 %v363_v14, %v1108_v7  ;;  %v228_v13 = vld [vmem:[%s1038_s21 + $0x78] sm:$0xff] }
  0x23   : > { %911 = vtanh.f32 %v488_v3  ;;  %v1133_v26 = vadd.f32 %v1043_v1, %v263_v11  ;;  %v396_v18 = vmul.f32 %v364_v23, %v1113_v10  ;;  %v264_v27 = vmul.f32 %v1033_v0, %v225_v15 }
  0x24   : > { %913 = vtanh.f32 %v489_v22  ;;  %v265_v28 = vmul.f32 %v1033_v0, %v226_v16  ;;  %v327_v29 = vmul.f32 0.5, %v1065_v19  ;;  %v490_v30 = vmul.f32 0.7978846, %v458_v24  ;;  %v229_v22 = vld [vmem:[%s1038_s21 + $0x80] sm:$0xff] }
  0x25   : > { %v427_v31 = vmul.f32 0.044715, %v395_v17  ;;  %v365_v32 = vmul.f32 %v1130_v25, %v1130_v25  ;;  %v1142_v33 = vmul.f32 0.5, %v1068_v20  ;;  %v428_v34 = vmul.f32 0.044715, %v396_v18 }
  0x26   : > { %v366_v35 = vmul.f32 %v1133_v26, %v1133_v26  ;;  %v1147_v36 = vadd.f32 %v1043_v1, %v264_v27  ;;  %915 = vtanh.f32 %v490_v30  ;;  %v1152_v40 = vadd.f32 %v1043_v1, %v265_v28  ;;  %v230_v30 = vld [vmem:[%s1038_s21 + $0x88] sm:$0xff] }
  0x27   : > { %v459_v39 = vadd.f32 %v427_v31, %v1108_v7  ;;  %v397_v19 = vmul.f32 %v365_v32, %v1130_v25  ;;  %v1156_v42 = vmul.f32 0.5, %v1082_v37  ;;  %v460_v20 = vadd.f32 %v428_v34, %v1113_v10  ;;  %v231_v31 = vld [vmem:[%s1038_s21 + $0x90] sm:$0xff] }
  0x28   : > { %v398_v43 = vmul.f32 %v366_v35, %v1133_v26  ;;  %v367_v44 = vmul.f32 %v1147_v36, %v1147_v36  ;;  %v1163_v46 = vmul.f32 0.5, %v1088_v45  ;;  %v368_v49 = vmul.f32 %v1152_v40, %v1152_v40 }
  0x29   : > { %v491_v47 = vmul.f32 0.7978846, %v459_v39  ;;  %v429_v48 = vmul.f32 0.044715, %v397_v19  ;;  %v492_v51 = vmul.f32 0.7978846, %v460_v20  ;;  %v266_v54 = vmul.f32 %v1033_v0, %v227_v41 }
  0x2a   : > { %v430_v53 = vmul.f32 0.044715, %v398_v43  ;;  %v399_v37 = vmul.f32 %v367_v44, %v1147_v36  ;;  %v400_v45 = vmul.f32 %v368_v49, %v1152_v40  ;;  %v267_v28 = vmul.f32 %v1033_v0, %v228_v13 }
  0x2b   : > { %v902_v50 = vpop.eup %901  ;;  %917 = vtanh.f32 %v491_v47  ;;  %v461_v57 = vadd.f32 %v429_v48, %v1130_v25  ;;  %v268_v34 = vmul.f32 %v1033_v0, %v229_v22  ;;  %v269_v20 = vmul.f32 %v1033_v0, %v230_v30 }
  0x2c   : > { %v904_v55 = vpop.eup %903  ;;  %v547_v56 = vadd.f32 1.0, %v902_v50  ;;  %919 = vtanh.f32 %v492_v51  ;;  %v462_v60 = vadd.f32 %v430_v53, %v1133_v26  ;;  %v431_v61 = vmul.f32 0.044715, %v399_v37 }
  0x2d   : > { %v906_v58 = vpop.eup %905  ;;  %v548_v59 = vadd.f32 1.0, %v904_v55  ;;  %v493_v3 = vmul.f32 0.7978846, %v461_v57  ;;  %v432_v4 = vmul.f32 0.044715, %v400_v45  ;;  %v1197_v39 = vadd.f32 %v1043_v1, %v267_v28 }
  0x2e   : > { %v908_v62 = vpop.eup %907  ;;  %v579_v63 = vmul.f32 %v547_v56, %v1084_v38  ;;  %v549_v2 = vadd.f32 1.0, %v906_v58  ;;  %v494_v9 = vmul.f32 0.7978846, %v462_v60  ;;  %v463_v11 = vadd.f32 %v431_v61, %v1147_v36 }
  0x2f   : > { %v910_v5 = vpop.eup %909  ;;  %v580_v6 = vmul.f32 %v548_v59, %v1094_v52  ;;  %v550_v8 = vadd.f32 1.0, %v908_v62  ;;  %921 = vtanh.f32 %v493_v3  ;;  %v464_v38 = vadd.f32 %v432_v4, %v1152_v40 }
  0x30   : > { %v912_v14 = vpop.eup %911  ;;  %612 = vst.msk [vmem:[#allocation2] sm:$0xff] %vm611_vm0, %v579_v63  ;;  %v581_v15 = vmul.f32 %v549_v2, %v1116_v12  ;;  %v551_v16 = vadd.f32 1.0, %v910_v5  ;;  %923 = vtanh.f32 %v494_v9  ;;  %v495_v24 = vmul.f32 0.7978846, %v463_v11 }
  0x31   : > { %613 = vst.msk [vmem:[#allocation2 + $0x8] sm:$0xff] %vm611_vm0, %v580_v6  ;;  %v582_v52 = vmul.f32 %v550_v8, %v1123_v21  ;;  %v552_v23 = vadd.f32 1.0, %v912_v14  ;;  %v914_v17 = vpop.eup %913  ;;  %v496_v27 = vmul.f32 0.7978846, %v464_v38  ;;  %v1184_v12 = vadd.f32 %v1043_v1, %v266_v54 }
  0x32   : > { %614 = vst.msk [vmem:[#allocation2 + $0x10] sm:$0xff] %vm611_vm0, %v581_v15  ;;  %v583_v18 = vmul.f32 %v551_v16, %v327_v29  ;;  %v553_v32 = vadd.f32 1.0, %v914_v17  ;;  %925 = vtanh.f32 %v495_v24  ;;  %v331_v29 = vmul.f32 0.5, %v1108_v7  ;;  %v232_v7 = vld [vmem:[%s1038_s21 + $0x98] sm:$0xff]  ;;  %v233_v15 = vld [vmem:[%s1038_s21 + $0xa0] sm:$0xff] }
  0x33   : > { %615 = vst.msk [vmem:[#allocation2 + $0x18] sm:$0xff] %vm611_vm0, %v582_v52  ;;  %v584_v21 = vmul.f32 %v552_v23, %v1142_v33  ;;  %927 = vtanh.f32 %v496_v27  ;;  %v369_v35 = vmul.f32 %v1184_v12, %v1184_v12  ;;  %v916_v19 = vpop.eup %915  ;;  %v1202_v41 = vadd.f32 %v1043_v1, %v268_v34 }
  0x34   : > { %616 = vst.msk [vmem:[#allocation2 + $0x20] sm:$0xff] %vm611_vm0, %v583_v18  ;;  %v585_v33 = vmul.f32 %v553_v32, %v1156_v42  ;;  %v270_v43 = vmul.f32 %v1033_v0, %v231_v31  ;;  %v554_v44 = vadd.f32 1.0, %v916_v19  ;;  %v332_v47 = vmul.f32 0.5, %v1113_v10  ;;  %v234_v31 = vld [vmem:[%s1038_s21 + $0xa8] sm:$0xff] }
  0x35   : > { %617 = vst.msk [vmem:[#allocation2 + $0x28] sm:$0xff] %vm611_vm0, %v584_v21  ;;  %v401_v48 = vmul.f32 %v369_v35, %v1184_v12  ;;  %v370_v49 = vmul.f32 %v1197_v39, %v1197_v39  ;;  %v333_v42 = vmul.f32 0.5, %v1130_v25  ;;  %v371_v50 = vmul.f32 %v1202_v41, %v1202_v41  ;;  %v235_v21 = vld [vmem:[%s1038_s21 + $0xb0] sm:$0xff] }
  0x36   : > { %618 = vst.msk [vmem:[#allocation2 + $0x30] sm:$0xff] %vm611_vm0, %v585_v33  ;;  %v1216_v51 = vadd.f32 %v1043_v1, %v269_v20  ;;  %v1219_v53 = vadd.f32 %v1043_v1, %v270_v43  ;;  %v586_v10 = vmul.f32 %v554_v44, %v1163_v46  ;;  %v271_v55 = vmul.f32 %v1033_v0, %v232_v7  ;;  %v236_v7 = vld [vmem:[%s1038_s21 + $0xb8] sm:$0xff] }
  0x37   : > { %v433_v37 = vmul.f32 0.044715, %v401_v48  ;;  %v402_v54 = vmul.f32 %v370_v49, %v1197_v39  ;;  %v334_v57 = vmul.f32 0.5, %v1133_v26  ;;  %v335_v25 = vmul.f32 0.5, %v1147_v36  ;;  %v237_v49 = vld [vmem:[%s1038_s21 + $0xc0] sm:$0xff] }
  0x38   : > { %v918_v56 = vpop.eup %917  ;;  %v403_v45 = vmul.f32 %v371_v50, %v1202_v41  ;;  %v372_v58 = vmul.f32 %v1216_v51, %v1216_v51  ;;  %619 = vst.msk [vmem:[#allocation2 + $0x38] sm:$0xff] %vm611_vm0, %v586_v10  ;;  %v373_v62 = vmul.f32 %v1219_v53, %v1219_v53  ;;  %v1235_v2 = vadd.f32 %v1043_v1, %v271_v55 }
  0x39   : > { %v920_v59 = vpop.eup %919  ;;  %v555_v60 = vadd.f32 1.0, %v918_v56  ;;  %v465_v46 = vadd.f32 %v433_v37, %v1184_v12  ;;  %v434_v61 = vmul.f32 0.044715, %v402_v54  ;;  %v336_v11 = vmul.f32 0.5, %v1152_v40  ;;  %v239_v54 = vld [vmem:[%s1038_s21 + $0xd0] sm:$0xff] }
  0x3a   : > { %v556_v63 = vadd.f32 1.0, %v920_v59  ;;  %v435_v26 = vmul.f32 0.044715, %v403_v45  ;;  %v404_v36 = vmul.f32 %v372_v58, %v1216_v51  ;;  %v405_v6 = vmul.f32 %v373_v62, %v1219_v53 }
  0x3b   : > { %v587_v3 = vmul.f32 %v555_v60, %v331_v29  ;;  %v497_v4 = vmul.f32 0.7978846, %v465_v46  ;;  %v466_v5 = vadd.f32 %v434_v61, %v1197_v39  ;;  %v374_v40 = vmul.f32 %v1235_v2, %v1235_v2 }
  0x3c   : > { %v922_v8 = vpop.eup %921  ;;  %v588_v9 = vmul.f32 %v556_v63, %v332_v47  ;;  %v467_v13 = vadd.f32 %v435_v26, %v1202_v41  ;;  %v436_v14 = vmul.f32 0.044715, %v404_v36  ;;  %v437_v52 = vmul.f32 0.044715, %v405_v6 }
  0x3d   : > { %v924_v16 = vpop.eup %923  ;;  %620 = vst.msk [vmem:[#allocation2 + $0x40] sm:$0xff] %vm611_vm0, %v587_v3  ;;  %v557_v38 = vadd.f32 1.0, %v922_v8  ;;  %929 = vtanh.f32 %v497_v4  ;;  %v498_v22 = vmul.f32 0.7978846, %v466_v5  ;;  %v272_v30 = vmul.f32 %v1033_v0, %v233_v15 }
  0x3e   : > { %621 = vst.msk [vmem:[#allocation2 + $0x48] sm:$0xff] %vm611_vm0, %v588_v9  ;;  %v558_v23 = vadd.f32 1.0, %v924_v16  ;;  %v499_v24 = vmul.f32 0.7978846, %v467_v13  ;;  %v468_v17 = vadd.f32 %v436_v14, %v1216_v51  ;;  %v469_v28 = vadd.f32 %v437_v52, %v1219_v53 }
  0x3f   : > { %v926_v18 = vpop.eup %925  ;;  %v589_v27 = vmul.f32 %v557_v38, %v333_v42  ;;  %931 = vtanh.f32 %v498_v22  ;;  %v406_v20 = vmul.f32 %v374_v40, %v1235_v2  ;;  %v1254_v43 = vadd.f32 %v1043_v1, %v272_v30  ;;  %v238_v42 = vld [vmem:[%s1038_s21 + $0xc8] sm:$0xff] }
  0x40   : > { %v928_v32 = vpop.eup %927  ;;  %v590_v34 = vmul.f32 %v558_v23, %v334_v57  ;;  %v559_v29 = vadd.f32 1.0, %v926_v18  ;;  %933 = vtanh.f32 %v499_v24  ;;  %v500_v35 = vmul.f32 0.7978846, %v468_v17 }
  0x41   : > { %622 = vst.msk [vmem:[#allocation2 + $0x50] sm:$0xff] %vm611_vm0, %v589_v27  ;;  %v560_v19 = vadd.f32 1.0, %v928_v32  ;;  %v501_v33 = vmul.f32 0.7978846, %v469_v28  ;;  %v273_v47 = vmul.f32 %v1033_v0, %v234_v31  ;;  %v274_v48 = vmul.f32 %v1033_v0, %v235_v21 }
  0x42   : > { %623 = vst.msk [vmem:[#allocation2 + $0x58] sm:$0xff] %vm611_vm0, %v590_v34  ;;  %v591_v44 = vmul.f32 %v559_v29, %v335_v25  ;;  %935 = vtanh.f32 %v500_v35  ;;  %v337_v10 = vmul.f32 0.5, %v1184_v12  ;;  %v438_v37 = vmul.f32 0.044715, %v406_v20 }
  0x43   : > { %v592_v50 = vmul.f32 %v560_v19, %v336_v11  ;;  %937 = vtanh.f32 %v501_v33  ;;  %v375_v55 = vmul.f32 %v1254_v43, %v1254_v43  ;;  %v1268_v56 = vadd.f32 %v1043_v1, %v273_v47 }
  0x44   : > { %624 = vst.msk [vmem:[#allocation2 + $0x60] sm:$0xff] %vm611_vm0, %v591_v44  ;;  %v1271_v57 = vadd.f32 %v1043_v1, %v274_v48  ;;  %v275_v25 = vmul.f32 %v1033_v0, %v236_v7  ;;  %v338_v12 = vmul.f32 0.5, %v1197_v39  ;;  %v470_v45 = vadd.f32 %v438_v37, %v1235_v2  ;;  %v240_v48 = vld [vmem:[%s1038_s21 + $0xd8] sm:$0xff]  ;;  %v242_v37 = vld [vmem:[%s1038_s21 + $0xe8] sm:$0xff] }
  0x45   : > { %625 = vst.msk [vmem:[#allocation2 + $0x68] sm:$0xff] %vm611_vm0, %v592_v50  ;;  %v276_v58 = vmul.f32 %v1033_v0, %v237_v49  ;;  %v277_v59 = vmul.f32 %v1033_v0, %v238_v42  ;;  %v339_v60 = vmul.f32 0.5, %v1202_v41  ;;  %v407_v46 = vmul.f32 %v375_v55, %v1254_v43  ;;  %v241_v49 = vld [vmem:[%s1038_s21 + $0xe0] sm:$0xff] }
  0x46   : > { %v376_v61 = vmul.f32 %v1268_v56, %v1268_v56  ;;  %v278_v62 = vmul.f32 %v1033_v0, %v239_v54  ;;  %v502_v63 = vmul.f32 0.7978846, %v470_v45  ;;  %v377_v26 = vmul.f32 %v1271_v57, %v1271_v57  ;;  %v243_v45 = vld [vmem:[%s1038_s21 + $0xf0] sm:$0xff] }
  0x47   : > { %v1287_v39 = vadd.f32 %v1043_v1, %v275_v25  ;;  %v1290_v36 = vadd.f32 %v1043_v1, %v276_v58  ;;  %v340_v3 = vmul.f32 0.5, %v1216_v51  ;;  %v439_v41 = vmul.f32 0.044715, %v407_v46  ;;  %v244_v58 = vld [vmem:[%s1038_s21 + $0xf8] sm:$0xff] }
  0x48   : > { %v408_v4 = vmul.f32 %v376_v61, %v1268_v56  ;;  %v1295_v5 = vadd.f32 %v1043_v1, %v277_v59  ;;  %v341_v6 = vmul.f32 0.5, %v1219_v53  ;;  %939 = vtanh.f32 %v502_v63  ;;  %v644_v61 = vld [vmem:[#allocation2] ss:$2 sm:$0xff] }
  0x49   : > { %v409_v8 = vmul.f32 %v377_v26, %v1271_v57  ;;  %v378_v9 = vmul.f32 %v1287_v39, %v1287_v39  ;;  %v1302_v13 = vmul.f32 0.5, %v1235_v2  ;;  %v471_v51 = vadd.f32 %v439_v41, %v1254_v43 }
  0x4a   : > { %v930_v11 = vpop.eup %929  ;;  %v440_v14 = vmul.f32 0.044715, %v408_v4  ;;  %v379_v15 = vmul.f32 %v1290_v36, %v1290_v36  ;;  %v1309_v22 = vadd.f32 %v1043_v1, %v278_v62  ;;  %v380_v17 = vmul.f32 %v1295_v5, %v1295_v5  ;;  %v676_v62 = vld [vmem:[#allocation2 + $0x1] ss:$2 sm:$0xff] }
  0x4b   : > { %v561_v16 = vadd.f32 1.0, %v930_v11  ;;  %v441_v38 = vmul.f32 0.044715, %v409_v8  ;;  %v410_v53 = vmul.f32 %v378_v9, %v1287_v39  ;;  %v503_v23 = vmul.f32 0.7978846, %v471_v51 }
  0x4c   : > { %v932_v52 = vpop.eup %931  ;;  %v472_v24 = vadd.f32 %v440_v14, %v1268_v56  ;;  %v411_v2 = vmul.f32 %v379_v15, %v1290_v36  ;;  %v412_v33 = vmul.f32 %v380_v17, %v1295_v5  ;;  %v1326_v55 = vmul.f32 0.5, %v1254_v43 }
  0x4d   : > { %v934_v40 = vpop.eup %933  ;;  %v593_v18 = vmul.f32 %v561_v16, %v337_v10  ;;  %v562_v27 = vadd.f32 1.0, %v932_v52  ;;  %v473_v28 = vadd.f32 %v441_v38, %v1271_v57  ;;  %v442_v30 = vmul.f32 0.044715, %v410_v53  ;;  %v646_v53 = vld [vmem:[#allocation2 + $0x10] ss:$2 sm:$0xff] }
  0x4e   : > { %v563_v31 = vadd.f32 1.0, %v934_v40  ;;  %941 = vtanh.f32 %v503_v23  ;;  %v504_v21 = vmul.f32 0.7978846, %v472_v24  ;;  %v443_v32 = vmul.f32 0.044715, %v411_v2 }
  0x4f   : > { %v936_v34 = vpop.eup %935  ;;  %626 = vst.msk [vmem:[#allocation2 + $0x70] sm:$0xff] %vm611_vm0, %v593_v18  ;;  %v594_v29 = vmul.f32 %v562_v27, %v338_v12  ;;  %v505_v35 = vmul.f32 0.7978846, %v473_v28  ;;  %v474_v19 = vadd.f32 %v442_v30, %v1287_v39  ;;  %v444_v10 = vmul.f32 0.044715, %v412_v33 }
  0x50   : > { %v938_v20 = vpop.eup %937  ;;  %v595_v7 = vmul.f32 %v563_v31, %v339_v60  ;;  %v564_v44 = vadd.f32 1.0, %v936_v34  ;;  %943 = vtanh.f32 %v504_v21  ;;  %v475_v47 = vadd.f32 %v443_v32, %v1290_v36  ;;  %v678_v52 = vld [vmem:[#allocation2 + $0x11] ss:$2 sm:$0xff]  ;;  %v648_v30 = vld [vmem:[#allocation2 + $0x20] ss:$2 sm:$0xff] }
  0x51   : > { %627 = vst.msk [vmem:[#allocation2 + $0x78] sm:$0xff] %vm611_vm0, %v594_v29  ;;  %v565_v42 = vadd.f32 1.0, %v938_v20  ;;  %945 = vtanh.f32 %v505_v35  ;;  %v506_v50 = vmul.f32 0.7978846, %v474_v19  ;;  %v381_v12 = vmul.f32 %v1309_v22, %v1309_v22  ;;  %v680_v29 = vld [vmem:[#allocation2 + $0x21] ss:$2 sm:$0xff] }
  0x52   : > { %628 = vst.msk [vmem:[#allocation2 + $0x80] sm:$0xff] %vm611_vm0, %v595_v7  ;;  %v596_v54 = vmul.f32 %v564_v44, %v340_v3  ;;  %v507_v25 = vmul.f32 0.7978846, %v475_v47  ;;  %v476_v60 = vadd.f32 %v444_v10, %v1295_v5  ;;  %v279_v46 = vmul.f32 %v1033_v0, %v240_v48  ;;  %v650_v47 = vld [vmem:[#allocation2 + $0x30] ss:$2 sm:$0xff] }
  0x53   : > { %v597_v59 = vmul.f32 %v565_v42, %v341_v6  ;;  %947 = vtanh.f32 %v506_v50  ;;  %v413_v43 = vmul.f32 %v381_v12, %v1309_v22  ;;  %v280_v63 = vmul.f32 %v1033_v0, %v241_v49  ;;  %v682_v48 = vld [vmem:[#allocation2 + $0x31] ss:$2 sm:$0xff] }
  0x54   : > { %629 = vst.msk [vmem:[#allocation2 + $0x88] sm:$0xff] %vm611_vm0, %v596_v54  ;;  %949 = vtanh.f32 %v507_v25  ;;  %v281_v26 = vmul.f32 %v1033_v0, %v242_v37  ;;  %v508_v3 = vmul.f32 0.7978846, %v476_v60  ;;  %v1340_v41 = vadd.f32 %v1043_v1, %v279_v46  ;;  %v652_v37 = vld [vmem:[#allocation2 + $0x40] ss:$2 sm:$0xff] }
  0x55   : > { %630 = vst.msk [vmem:[#allocation2 + $0x90] sm:$0xff] %vm611_vm0, %v597_v59  ;;  %v282_v4 = vmul.f32 %v1033_v0, %v243_v45  ;;  %v283_v6 = vmul.f32 %v1033_v0, %v244_v58  ;;  %v940_v8 = vpop.eup %939  ;;  %v445_v9 = vmul.f32 0.044715, %v413_v43  ;;  %v1345_v11 = vadd.f32 %v1043_v1, %v280_v63  ;;  %v684_v54 = vld [vmem:[#allocation2 + $0x41] ss:$2 sm:$0xff] }
  0x56   : > { %v1348_v51 = vadd.f32 %v1043_v1, %v281_v26  ;;  %v707_v14 = vmax.f32 %v644_v61, %v676_v62  ;;  %v566_v15 = vadd.f32 1.0, %v940_v8  ;;  %v344_v16 = vmul.f32 0.5, %v1268_v56  ;;  %v654_v25 = vld [vmem:[#allocation2 + $0x50] ss:$2 sm:$0xff]  ;;  %v686_v12 = vld [vmem:[#allocation2 + $0x51] ss:$2 sm:$0xff] }
  0x57   : > { %951 = vtanh.f32 %v508_v3  ;;  %v382_v38 = vmul.f32 %v1340_v41, %v1340_v41  ;;  %v345_v0 = vmul.f32 0.5, %v1271_v57  ;;  %v1355_v23 = vmul.f32 0.5, %v1287_v39  ;;  %v656_v46 = vld [vmem:[#allocation2 + $0x60] ss:$2 sm:$0xff]  ;;  %v688_v61 = vld [vmem:[#allocation2 + $0x61] ss:$2 sm:$0xff] }
  0x58   : > { %v477_v24 = vadd.f32 %v445_v9, %v1309_v22  ;;  %v383_v2 = vmul.f32 %v1345_v11, %v1345_v11  ;;  %723 = vst.msk [vmem:[#allocation3] sm:$0xff] %vm611_vm0, %v707_v14  ;;  %v598_v56 = vmul.f32 %v566_v15, %v1302_v13  ;;  %v384_v40 = vmul.f32 %v1348_v51, %v1348_v51  ;;  %v658_v3 = vld [vmem:[#allocation2 + $0x70] ss:$2 sm:$0xff] }
  0x59   : > { %v414_v17 = vmul.f32 %v382_v38, %v1340_v41  ;;  %v1366_v18 = vadd.f32 %v1043_v1, %v282_v4  ;;  %v1370_v27 = vadd.f32 %v1043_v1, %v283_v6  ;;  %v708_v28 = vmax.f32 %v646_v53, %v678_v52  ;;  %v690_v4 = vld [vmem:[#allocation2 + $0x71] ss:$2 sm:$0xff] }
  0x5a   : > { %v509_v57 = vmul.f32 0.7978846, %v477_v24  ;;  %v415_v39 = vmul.f32 %v383_v2, %v1345_v11  ;;  %631 = vst.msk [vmem:[#allocation2 + $0x98] sm:$0xff] %vm611_vm0, %v598_v56  ;;  %v1374_v13 = vmul.f32 0.5, %v1290_v36  ;;  %v416_v32 = vmul.f32 %v384_v40, %v1348_v51 }
  0x5b   : > { %v942_v31 = vpop.eup %941  ;;  %v446_v21 = vmul.f32 0.044715, %v414_v17  ;;  %v385_v34 = vmul.f32 %v1366_v18, %v1366_v18  ;;  %v1380_v19 = vmul.f32 0.5, %v1295_v5  ;;  %724 = vst.msk [vmem:[#allocation3 + $0x8] sm:$0xff] %vm611_vm0, %v708_v28  ;;  %v386_v44 = vmul.f32 %v1370_v27, %v1370_v27  ;;  %v660_v6 = vld [vmem:[#allocation2 + $0x80] ss:$2 sm:$0xff] }
  0x5c   : > { %v567_v35 = vadd.f32 1.0, %v942_v31  ;;  %953 = vtanh.f32 %v509_v57  ;;  %v447_v1 = vmul.f32 0.044715, %v415_v39  ;;  %v448_v36 = vmul.f32 0.044715, %v416_v32 }
  0x5d   : > { %v944_v33 = vpop.eup %943  ;;  %v478_v20 = vadd.f32 %v446_v21, %v1340_v41  ;;  %v417_v7 = vmul.f32 %v385_v34, %v1366_v18  ;;  %v709_v10 = vmax.f32 %v648_v30, %v680_v29  ;;  %v418_v63 = vmul.f32 %v386_v44, %v1370_v27  ;;  %v692_v38 = vld [vmem:[#allocation2 + $0x81] ss:$2 sm:$0xff] }
  0x5e   : > { %v946_v49 = vpop.eup %945  ;;  %v599_v42 = vmul.f32 %v567_v35, %v1326_v55  ;;  %v568_v5 = vadd.f32 1.0, %v944_v33  ;;  %v479_v50 = vadd.f32 %v447_v1, %v1345_v11  ;;  %v480_v59 = vadd.f32 %v448_v36, %v1348_v51 }
  0x5f   : > { %v569_v45 = vadd.f32 1.0, %v946_v49  ;;  %v510_v58 = vmul.f32 0.7978846, %v478_v20  ;;  %v449_v60 = vmul.f32 0.044715, %v417_v7  ;;  %725 = vst.msk [vmem:[#allocation3 + $0x10] sm:$0xff] %vm611_vm0, %v709_v10  ;;  %v710_v26 = vmax.f32 %v650_v47, %v682_v48 }
  0x60   : > { %v948_v62 = vpop.eup %947  ;;  %632 = vst.msk [vmem:[#allocation2 + $0xa0] sm:$0xff] %vm611_vm0, %v599_v42  ;;  %v600_v43 = vmul.f32 %v568_v5, %v344_v16  ;;  %v511_v55 = vmul.f32 0.7978846, %v479_v50  ;;  %v512_v15 = vmul.f32 0.7978846, %v480_v59  ;;  %v712_v56 = vmax.f32 %v654_v25, %v686_v12  ;;  %v739_v40 = vld [vmem:[#allocation3] sm:$0xff] }
  0x61   : > { %v950_v8 = vpop.eup %949  ;;  %v601_v9 = vmul.f32 %v569_v45, %v345_v0  ;;  %v570_v14 = vadd.f32 1.0, %v948_v62  ;;  %955 = vtanh.f32 %v510_v58  ;;  %v481_v16 = vadd.f32 %v449_v60, %v1366_v18  ;;  %726 = vst.msk [vmem:[#allocation3 + $0x18] sm:$0xff] %vm611_vm0, %v710_v26  ;;  %v662_v24 = vld [vmem:[#allocation2 + $0x90] ss:$2 sm:$0xff]  ;;  %v694_v17 = vld [vmem:[#allocation2 + $0x91] ss:$2 sm:$0xff] }
  0x62   : > { %633 = vst.msk [vmem:[#allocation2 + $0xa8] sm:$0xff] %vm611_vm0, %v600_v43  ;;  %v571_v53 = vadd.f32 1.0, %v950_v8  ;;  %957 = vtanh.f32 %v511_v55  ;;  %v450_v52 = vmul.f32 0.044715, %v418_v63  ;;  %v711_v0 = vmax.f32 %v652_v37, %v684_v54  ;;  %v748_v57 = vld [vmem:[#allocation3 + $0x8] sm:$0xff]  ;;  %728 = vst.msk [vmem:[#allocation3 + $0x28] sm:$0xff] %vm611_vm0, %v712_v56 }
  0x63   : > { %634 = vst.msk [vmem:[#allocation2 + $0xb0] sm:$0xff] %vm611_vm0, %v601_v9  ;;  %v602_v2 = vmul.f32 %v570_v14, %v1355_v23  ;;  %959 = vtanh.f32 %v512_v15  ;;  %v513_v30 = vmul.f32 0.7978846, %v481_v16  ;;  %v713_v21 = vmax.f32 %v656_v46, %v688_v61 }
  0x64   : > { %v952_v39 = vpop.eup %951  ;;  %v603_v28 = vmul.f32 %v571_v53, %v1374_v13  ;;  %v482_v31 = vadd.f32 %v450_v52, %v1370_v27  ;;  %727 = vst.msk [vmem:[#allocation3 + $0x20] sm:$0xff] %vm611_vm0, %v711_v0  ;;  %v714_v23 = vmax.f32 %v658_v3, %v690_v4  ;;  %v715_v34 = vmax.f32 %v660_v6, %v692_v38 }
  0x65   : > { %635 = vst.msk [vmem:[#allocation2 + $0xb8] sm:$0xff] %vm611_vm0, %v602_v2  ;;  %v572_v32 = vadd.f32 1.0, %v952_v39  ;;  %v716_v29 = vmax.f32 %v662_v24, %v694_v17  ;;  %961 = vtanh.f32 %v513_v30  ;;  %729 = vst.msk [vmem:[#allocation3 + $0x30] sm:$0xff] %vm611_vm0, %v713_v21  ;;  %v756_v35 = vmax.f32 %v739_v40, %v748_v57 }
  0x66   : > { %636 = vst.msk [vmem:[#allocation2 + $0xc0] sm:$0xff] %vm611_vm0, %v603_v28  ;;  %v514_v13 = vmul.f32 0.7978846, %v482_v31  ;;  %730 = vst.msk [vmem:[#allocation3 + $0x38] sm:$0xff] %vm611_vm0, %v714_v23  ;;  %v740_v33 = vld [vmem:[#allocation3 + $0x10] sm:$0xff]  ;;  %v349_v20 = vmul.f32 0.5, %v1309_v22 }
  0x67   : > { %v604_v1 = vmul.f32 %v572_v32, %v1380_v19  ;;  %731 = vst.msk [vmem:[#allocation3 + $0x40] sm:$0xff] %vm611_vm0, %v715_v34  ;;  %732 = vst.msk [vmem:[#allocation3 + $0x48] sm:$0xff] %vm611_vm0, %v716_v29  ;;  %v350_v10 = vmul.f32 0.5, %v1340_v41  ;;  %v351_v45 = vmul.f32 0.5, %v1345_v11  ;;  %v352_v43 = vmul.f32 0.5, %v1348_v51 }
  0x68   : > { %963 = vtanh.f32 %v514_v13  ;;  %764 = vst.msk [vmem:[%s1407_s27] sm:$0xff] %vm611_vm0, %v756_v35  ;;  %v749_v47 = vld [vmem:[#allocation3 + $0x18] sm:$0xff]  ;;  %v353_v51 = vmul.f32 0.5, %v1366_v18  ;;  %v354_v53 = vmul.f32 0.5, %v1370_v27 }
  0x69   : > { %v954_v36 = vpop.eup %953  ;;  %637 = vst.msk [vmem:[#allocation2 + $0xc8] sm:$0xff] %vm611_vm0, %v604_v1  ;;  %v664_v7 = vld [vmem:[#allocation2 + $0xa0] ss:$2 sm:$0xff]  ;;  %v696_v44 = vld [vmem:[#allocation2 + $0xa1] ss:$2 sm:$0xff]  ;;  %v757_v49 = vmax.f32 %v740_v33, %v749_v47 }
  0x6a   : > { %v573_v19 = vadd.f32 1.0, %v954_v36  ;;  %v717_v48 = vmax.f32 %v664_v7, %v696_v44  ;;  %v750_v54 = vld [vmem:[#allocation3 + $0x28] sm:$0xff] }
  0x6b   : > { %765 = vst.msk [vmem:[%s1407_s27 + $0x8] sm:$0xff] %vm611_vm0, %v757_v49  ;;  %v741_v22 = vld [vmem:[#allocation3 + $0x20] sm:$0xff] }
  0x6c   : > { %v605_v42 = vmul.f32 %v573_v19, %v349_v20  ;;  %733 = vst.msk [vmem:[#allocation3 + $0x50] sm:$0xff] %vm611_vm0, %v717_v48  ;;  %v666_v5 = vld [vmem:[#allocation2 + $0xb0] ss:$2 sm:$0xff]  ;;  %v698_v50 = vld [vmem:[#allocation2 + $0xb1] ss:$2 sm:$0xff]  ;;  %v758_v58 = vmax.f32 %v741_v22, %v750_v54 }
  0x6d   : > { %v718_v37 = vmax.f32 %v666_v5, %v698_v50  ;;  %v742_v25 = vld [vmem:[#allocation3 + $0x30] sm:$0xff]  ;;  %v751_v59 = vld [vmem:[#allocation3 + $0x38] sm:$0xff] }
  0x6e   : > { %v956_v12 = vpop.eup %955  ;;  %638 = vst.msk [vmem:[#allocation2 + $0xd0] sm:$0xff] %vm611_vm0, %v605_v42  ;;  %v743_v60 = vld [vmem:[#allocation3 + $0x40] sm:$0xff]  ;;  %v752_v46 = vld [vmem:[#allocation3 + $0x48] sm:$0xff]  ;;  %v759_v41 = vmax.f32 %v742_v25, %v751_v59  ;;  %766 = vst.msk [vmem:[%s1407_s27 + $0x10] sm:$0xff] %vm611_vm0, %v758_v58 }
  0x6f   : > { %v958_v61 = vpop.eup %957  ;;  %v574_v62 = vadd.f32 1.0, %v956_v12  ;;  %734 = vst.msk [vmem:[#allocation3 + $0x58] sm:$0xff] %vm611_vm0, %v718_v37  ;;  %v760_v55 = vmax.f32 %v743_v60, %v752_v46 }
  0x70   : > { %v960_v63 = vpop.eup %959  ;;  %v575_v26 = vadd.f32 1.0, %v958_v61  ;;  %v668_v3 = vld [vmem:[#allocation2 + $0xc0] ss:$2 sm:$0xff]  ;;  %v700_v4 = vld [vmem:[#allocation2 + $0xc1] ss:$2 sm:$0xff]  ;;  %767 = vst.msk [vmem:[%s1407_s27 + $0x18] sm:$0xff] %vm611_vm0, %v759_v41 }
  0x71   : > { %v606_v11 = vmul.f32 %v574_v62, %v350_v10  ;;  %v576_v6 = vadd.f32 1.0, %v960_v63  ;;  %v719_v8 = vmax.f32 %v668_v3, %v700_v4  ;;  %768 = vst.msk [vmem:[%s1407_s27 + $0x20] sm:$0xff] %vm611_vm0, %v760_v55 }
  0x72   : > { %v607_v9 = vmul.f32 %v575_v26, %v351_v45  ;;  %v962_v14 = vpop.eup %961 }
  0x73   : > { %639 = vst.msk [vmem:[#allocation2 + $0xd8] sm:$0xff] %vm611_vm0, %v606_v11  ;;  %v608_v15 = vmul.f32 %v576_v6, %v352_v43  ;;  %735 = vst.msk [vmem:[#allocation3 + $0x60] sm:$0xff] %vm611_vm0, %v719_v8  ;;  %v577_v38 = vadd.f32 1.0, %v962_v14  ;;  %v744_v16 = vld [vmem:[#allocation3 + $0x50] sm:$0xff] }
  0x74   : > { %640 = vst.msk [vmem:[#allocation2 + $0xe0] sm:$0xff] %vm611_vm0, %v607_v9 }
  0x75   : > { %v964_v52 = vpop.eup %963  ;;  %641 = vst.msk [vmem:[#allocation2 + $0xe8] sm:$0xff] %vm611_vm0, %v608_v15  ;;  %v609_v24 = vmul.f32 %v577_v38, %v353_v51 }
  0x76   : > { %v578_v2 = vadd.f32 1.0, %v964_v52  ;;  %v753_v0 = vld [vmem:[#allocation3 + $0x58] sm:$0xff] }
  0x77   : > { %v761_v18 = vmax.f32 %v744_v16, %v753_v0  ;;  %642 = vst.msk [vmem:[#allocation2 + $0xf0] sm:$0xff] %vm611_vm0, %v609_v24 }
  0x78   : > { %v610_v56 = vmul.f32 %v578_v2, %v354_v53 }
  0x79   : > { %769 = vst.msk [vmem:[%s1407_s27 + $0x28] sm:$0xff] %vm611_vm0, %v761_v18 }
  0x7a   : > { %643 = vst.msk [vmem:[#allocation2 + $0xf8] sm:$0xff] %vm611_vm0, %v610_v56  ;;  %v670_v17 = vld [vmem:[#allocation2 + $0xd0] ss:$2 sm:$0xff]  ;;  %v702_v40 = vld [vmem:[#allocation2 + $0xd1] ss:$2 sm:$0xff]  ;;  %v745_v32 = vld [vmem:[#allocation3 + $0x60] sm:$0xff] }
  0x7b   : > { %v720_v57 = vmax.f32 %v670_v17, %v702_v40 }
  0x7c   : > { %v672_v27 = vld [vmem:[#allocation2 + $0xe0] ss:$2 sm:$0xff]  ;;  %v704_v39 = vld [vmem:[#allocation2 + $0xe1] ss:$2 sm:$0xff] }
  0x7d   : > { %736 = vst.msk [vmem:[#allocation3 + $0x68] sm:$0xff] %vm611_vm0, %v720_v57  ;;  %v721_v28 = vmax.f32 %v672_v27, %v704_v39 }
  0x7f   : > { %737 = vst.msk [vmem:[#allocation3 + $0x70] sm:$0xff] %vm611_vm0, %v721_v28 }
  0x81   : > { %v674_v30 = vld [vmem:[#allocation2 + $0xf0] ss:$2 sm:$0xff]  ;;  %v706_v31 = vld [vmem:[#allocation2 + $0xf1] ss:$2 sm:$0xff] }
  0x82   : > { %v722_v21 = vmax.f32 %v674_v30, %v706_v31 }
  0x84   : > { %738 = vst.msk [vmem:[#allocation3 + $0x78] sm:$0xff] %vm611_vm0, %v722_v21  ;;  %v754_v23 = vld [vmem:[#allocation3 + $0x68] sm:$0xff] }
  0x85   : > { %v762_v34 = vmax.f32 %v745_v32, %v754_v23 }
  0x86   : > { %v746_v29 = vld [vmem:[#allocation3 + $0x70] sm:$0xff] }
  0x87   : > { %770 = vst.msk [vmem:[%s1407_s27 + $0x30] sm:$0xff] %vm611_vm0, %v762_v34 }
  0x8b   : > { %v755_v13 = vld [vmem:[#allocation3 + $0x78] sm:$0xff] }
  0x8c   : > { %v763_v35 = vmax.f32 %v746_v29, %v755_v13 }
  0x8e   : > { %771 = vst.msk [vmem:[%s1407_s27 + $0x38] sm:$0xff] %vm611_vm0, %v763_v35 }
  0x8f PF: > { %s13_s14 = sadd.s32 1, %s987_s14   ;;  %s1463_s12 = smov %s983_s13 }
  0x90   : > { %p10_p5 = scmp.ge.s32.totalorder %s13_s14, 4   ;;  %s1464_s13 = smov %s1466_s15 }
  0x92   :  { %12 = sbr.rel (!%p10_p5) target bundleno = 2 (0x2), region = 94 }

// kernel: unet_down.6
= control target key start
LH: loop header
LB: loop body
LE: loop exit
PB: predicated region body
PF: predicated region fallthrough
CT: control target
= control target key end

     0   :  { %s1078_s15 = smov 0   ;;  %s1385_s0 = inlined_call_operand.vmem [shape: bf16[512,72], index: 0, kind: input, shape index: {}]   ;;  %s1386_s1 = inlined_call_operand.vmem [shape: bf16[72,8], index: 1, kind: input, shape index: {}]   ;;  %s1387_s2 = inlined_call_operand.vmem [shape: f32[512,8], index: 2, kind: output, shape index: {0}]   ;;  %s1388_s3 = inlined_call_operand.vmem [shape: f32[2,1,8], index: 3, kind: output, shape index: {1}]   ;;  %s1389_s4 = inlined_call_operand.vmem [shape: f32[2,1,8], index: 4, kind: output, shape index: {2}]  }
   0x1 LB: > { %s1084_s16 = sadd.s32 4294967295, %s1051_s15   ;;  %p897_p0 = scmp.ge.s32.totalorder %s1051_s15, 1  ;;  %s1051_s15 = sphi %s1078_s15, %s15_s15  }
   0x2   : > { %p168_p1 = scmp.lt.s32.totalorder %s1051_s15, 3 }
   0x4   : > { %p169_p2 = pnand %p897_p0, %p168_p1 }
   0x5   : > { %s898_s21 = sshll.u32 (!%p169_p2), %s1084_s16, 5  ;;  %p212_p4 = scmp.lt.s32.totalorder (!%p169_p2), %s1084_s16, 1 }
   0x6   : > { %172 = sbr.rel (%p169_p2) target bundleno = 309 (0x135), region = 28  ;;  %p201_p3 = scmp.lt.s32.totalorder (!%p169_p2), %s898_s21, 63 }
   0xb   : > { %v1024_v0 = vld [vmem:[%s1386_s1 + $0x20] ss:$0 sps:$4 sm:$0xff]   ;;  %vm416_vm0 = vcmask 1043456   ;;  %v1025_v1 = vld [vmem:[%s1386_s1 + $0x18] sm:$0xff]   ;;  %v1026_v3 = vld [vmem:[%s1386_s1 + $0x10] sm:$0xff]   ;;  %s1391_s21 = smov (!%p201_p3, %s898_s21), 63 }
   0xc   : > { %1014 = vmatprep.subr.msk.bf16.mxu0 %vm416_vm0, %v1024_v0  ;;  %v418_v2 = vsel %vm416_vm0, %v1024_v0, 0  ;;  %1015 = vmatprep.subr.msk.bf16.mxu1 %vm416_vm0, %v1024_v0  ;;  %v1027_v4 = vld [vmem:[%s1386_s1 + $0x8] sm:$0xff]   ;;  %s899_s26 = sshll.u32 %s1391_s21, 2  ;;  %vm367_vm1 = vcmask 588800   ;;  %v1028_v6 = vld [vmem:[%s1386_s1] sm:$0xff]   ;;  %s901_s6 = sshll.u32 %s1391_s21, 3 }
   0xd   : > { %963 = vmatpush3.bf16.msra.mxu0 %v418_v2  ;;  %1009 = vmatpush3.bf16.msra.mxu1 %v418_v2  ;;  %s1107_s29 = scalar_lea.vmem %s1385_s0, %s899_s26  ;;  %s1148_s9 = scalar_lea.vmem %s1387_s2, %s901_s6  ;;  %vm581_vm2 = vcmask 64512   ;;  %vm683_vm3 = vcmask 57344  }
   0xe   : > { %964 = vmatprep.subr.bf16.mxu0 %v1025_v1  ;;  %1005 = vmatprep.subr.bf16.mxu1 %v1025_v1  ;;  %v1029_v5 = vld [vmem:[%s1107_s29] sm:$0xff]   ;;  %v1030_v7 = vld [vmem:[%s1107_s29 + $0x8] sm:$0xff]   ;;  %v1031_v8 = vld [vmem:[%s1107_s29 + $0x10] sm:$0xff]   ;;  %s1393_s16 = smov (!%p212_p4, %s1084_s16), 1 }
   0xf   : > { %972 = vmatprep.mubr.msk.bf16.mxu0 %vm367_vm1, %v1029_v5  ;;  %v1037_v9 = vld [vmem:[%s1107_s29 + $0x40] sm:$0xff]   ;;  %v1038_v10 = vld [vmem:[%s1107_s29 + $0x48] sm:$0xff]   ;;  %v1039_v11 = vld [vmem:[%s1107_s29 + $0x50] sm:$0xff]   ;;  %s214_s12 = scalar_lea.vmem %s1388_s3, %s1393_s16  ;;  %s217_s17 = scalar_lea.vmem %s1389_s4, %s1393_s16 }
  0x10   : > { %988 = vmatprep.mubr.msk.bf16.mxu1 %vm367_vm1, %v1037_v9  ;;  %v1032_v12 = vld [vmem:[%s1107_s29 + $0x18] sm:$0xff]   ;;  %v1033_v14 = vld [vmem:[%s1107_s29 + $0x20] sm:$0xff]   ;;  %v1034_v16 = vld [vmem:[%s1107_s29 + $0x28] sm:$0xff]  }
  0x11   : > { %965 = vmatpush3.bf16.msra.mxu0 %v1025_v1  ;;  %1010 = vmatpush3.bf16.msra.mxu1 %v1025_v1  ;;  %v1040_v13 = vld [vmem:[%s1107_s29 + $0x58] sm:$0xff]   ;;  %v1041_v15 = vld [vmem:[%s1107_s29 + $0x60] sm:$0xff]   ;;  %v1042_v17 = vld [vmem:[%s1107_s29 + $0x68] sm:$0xff]  }
  0x12   : > { %966 = vmatprep.subr.bf16.mxu0 %v1026_v3  ;;  %1006 = vmatprep.subr.bf16.mxu1 %v1026_v3  ;;  %v1035_v18 = vld [vmem:[%s1107_s29 + $0x30] sm:$0xff]   ;;  %v1036_v20 = vld [vmem:[%s1107_s29 + $0x38] sm:$0xff]  }
  0x13   : > { %v1043_v19 = vld [vmem:[%s1107_s29 + $0x70] sm:$0xff]   ;;  %v1044_v21 = vld [vmem:[%s1107_s29 + $0x78] sm:$0xff]  }
  0x15   : > { %967 = vmatpush3.bf16.msra.mxu0 %v1026_v3  ;;  %1011 = vmatpush3.bf16.msra.mxu1 %v1026_v3 }
  0x16   : > { %968 = vmatprep.subr.bf16.mxu0 %v1027_v4  ;;  %1007 = vmatprep.subr.bf16.mxu1 %v1027_v4 }
  0x19   : > { %969 = vmatpush3.bf16.msra.mxu0 %v1027_v4  ;;  %1012 = vmatpush3.bf16.msra.mxu1 %v1027_v4 }
  0x1a   : > { %970 = vmatprep.subr.bf16.mxu0 %v1028_v6  ;;  %1008 = vmatprep.subr.bf16.mxu1 %v1028_v6 }
  0x1d   : > { %971 = vmatpush3.bf16.msra.mxu0 %v1028_v6  ;;  %1013 = vmatpush3.bf16.msra.mxu1 %v1028_v6 }
  0x20   : > { %973 = vmatmul.mubr.msk.bf16.vlgmr.msra.gmra.mxu0 %vm367_vm1, %v1030_v7  ;;  %989 = vmatmul.mubr.msk.bf16.vlgmr.msra.gmra.mxu1 %vm367_vm1, %v1038_v10 }
  0x21   : > { %976 = vmatprep.mubr.msk.bf16.mxu0 %vm367_vm1, %v1031_v8  ;;  %992 = vmatprep.mubr.msk.bf16.mxu1 %vm367_vm1, %v1039_v11 }
  0x28   : > { %977 = vmatmul.mubr.msk.bf16.gmra.mxu0 %vm367_vm1, %v1032_v12  ;;  %993 = vmatmul.mubr.msk.bf16.gmra.mxu1 %vm367_vm1, %v1040_v13 }
  0x29   : > { %980 = vmatprep.mubr.msk.bf16.mxu0 %vm367_vm1, %v1033_v14  ;;  %996 = vmatprep.mubr.msk.bf16.mxu1 %vm367_vm1, %v1041_v15 }
  0x30   : > { %981 = vmatmul.mubr.msk.bf16.gmra.mxu0 %vm367_vm1, %v1034_v16  ;;  %997 = vmatmul.mubr.msk.bf16.gmra.mxu1 %vm367_vm1, %v1042_v17 }
  0x31   : > { %984 = vmatprep.mubr.msk.bf16.mxu0 %vm367_vm1, %v1035_v18  ;;  %1000 = vmatprep.mubr.msk.bf16.mxu1 %vm367_vm1, %v1043_v19 }
  0x38   : > { %985 = vmatmul.mubr.msk.bf16.gmra.mxu0 %vm367_vm1, %v1036_v20  ;;  %1001 = vmatmul.mubr.msk.bf16.gmra.mxu1 %vm367_vm1, %v1044_v21 }
  0xe0   : > { %v974_v22 = vpop.f32.mrf.mxu0  ;;  %v1150_v23 = vpop.f32.mrf.mxu1 }
  0xe1   : > { %584 = vst.msk [vmem:[%s1148_s9 + $0x10] sm:$0xff] %vm581_vm2, %v974_v22  ;;  %600 = vst.msk [vmem:[%s1148_s9 + $0x90] sm:$0xff] %vm581_vm2, %v1150_v23  ;;  %v687_v31 = vmul.f32 %v974_v22, %v974_v22  ;;  %v617_v38 = vsel %vm581_vm2, %v974_v22, 0.0 }
  0xe2   : > { %v454_v24 = vpop.f32.mrf.mxu0  ;;  %v1157_v25 = vpop.f32.mrf.mxu1 }
  0xe3   : > { %582 = vst.msk [vmem:[%s1148_s9] sm:$0xff] %vm581_vm2, %v454_v24  ;;  %598 = vst.msk [vmem:[%s1148_s9 + $0x80] sm:$0xff] %vm581_vm2, %v1157_v25  ;;  %v685_v28 = vmul.f32 %v454_v24, %v454_v24  ;;  %v614_v32 = vsel %vm581_vm2, %v454_v24, 0.0  ;;  %v720_v46 = vsel %vm581_vm2, %v687_v31, 0.0 }
  0xe4   : > { %v975_v26 = vpop.f32.mrf.mxu0  ;;  %v1164_v27 = vpop.f32.mrf.mxu1 }
  0xe5   : > { %585 = vst.msk [vmem:[%s1148_s9 + $0x18] sm:$0xff] %vm581_vm2, %v975_v26  ;;  %601 = vst.msk [vmem:[%s1148_s9 + $0x98] sm:$0xff] %vm581_vm2, %v1164_v27  ;;  %v717_v39 = vsel %vm581_vm2, %v685_v28, 0.0  ;;  %v688_v40 = vmul.f32 %v975_v26, %v975_v26  ;;  %v619_v47 = vsel %vm581_vm2, %v975_v26, 0.0 }
  0xe6   : > { %v457_v29 = vpop.f32.mrf.mxu0  ;;  %v1171_v30 = vpop.f32.mrf.mxu1 }
  0xe7   : > { %583 = vst.msk [vmem:[%s1148_s9 + $0x8] sm:$0xff] %vm581_vm2, %v457_v29  ;;  %v615_v33 = vsel %vm581_vm2, %v457_v29, 0.0  ;;  %v686_v34 = vmul.f32 %v457_v29, %v457_v29  ;;  %599 = vst.msk [vmem:[%s1148_s9 + $0x88] sm:$0xff] %vm581_vm2, %v1171_v30  ;;  %v722_v53 = vsel %vm581_vm2, %v688_v40, 0.0 }
  0xe8   : > { %v616_v35 = vadd.f32 %v615_v33, %v614_v32  ;;  %v978_v36 = vpop.f32.mrf.mxu0  ;;  %v1180_v37 = vpop.f32.mrf.mxu1 }
  0xe9   : > { %v718_v41 = vsel %vm581_vm2, %v686_v34, 0.0  ;;  %588 = vst.msk [vmem:[%s1148_s9 + $0x30] sm:$0xff] %vm581_vm2, %v978_v36  ;;  %604 = vst.msk [vmem:[%s1148_s9 + $0xb0] sm:$0xff] %vm581_vm2, %v1180_v37  ;;  %v691_v59 = vmul.f32 %v978_v36, %v978_v36  ;;  %v625_v3 = vsel %vm581_vm2, %v978_v36, 0.0 }
  0xea   : > { %v618_v42 = vadd.f32 %v617_v38, %v616_v35  ;;  %v719_v43 = vadd.f32 %v718_v41, %v717_v39  ;;  %v470_v44 = vpop.f32.mrf.mxu0  ;;  %v1190_v45 = vpop.f32.mrf.mxu1 }
  0xeb   : > { %586 = vst.msk [vmem:[%s1148_s9 + $0x20] sm:$0xff] %vm581_vm2, %v470_v44  ;;  %v689_v48 = vmul.f32 %v470_v44, %v470_v44  ;;  %602 = vst.msk [vmem:[%s1148_s9 + $0xa0] sm:$0xff] %vm581_vm2, %v1190_v45  ;;  %v621_v54 = vsel %vm581_vm2, %v470_v44, 0.0  ;;  %v728_v10 = vsel %vm581_vm2, %v691_v59, 0.0 }
  0xec   : > { %v721_v49 = vadd.f32 %v720_v46, %v719_v43  ;;  %v620_v50 = vadd.f32 %v619_v47, %v618_v42  ;;  %v979_v51 = vpop.f32.mrf.mxu0  ;;  %v1199_v52 = vpop.f32.mrf.mxu1 }
  0xed   : > { %589 = vst.msk [vmem:[%s1148_s9 + $0x38] sm:$0xff] %vm581_vm2, %v979_v51  ;;  %605 = vst.msk [vmem:[%s1148_s9 + $0xb8] sm:$0xff] %vm581_vm2, %v1199_v52  ;;  %v724_v60 = vsel %vm581_vm2, %v689_v48, 0.0  ;;  %v692_v4 = vmul.f32 %v979_v51, %v979_v51  ;;  %v627_v11 = vsel %vm581_vm2, %v979_v51, 0.0 }
  0xee   : > { %v622_v55 = vadd.f32 %v621_v54, %v620_v50  ;;  %v723_v56 = vadd.f32 %v722_v53, %v721_v49  ;;  %v473_v57 = vpop.f32.mrf.mxu0  ;;  %v1208_v58 = vpop.f32.mrf.mxu1 }
  0xef   : > { %587 = vst.msk [vmem:[%s1148_s9 + $0x28] sm:$0xff] %vm581_vm2, %v473_v57  ;;  %v623_v61 = vsel %vm581_vm2, %v473_v57, 0.0  ;;  %v690_v62 = vmul.f32 %v473_v57, %v473_v57  ;;  %603 = vst.msk [vmem:[%s1148_s9 + $0xa8] sm:$0xff] %vm581_vm2, %v1208_v58  ;;  %v730_v17 = vsel %vm581_vm2, %v692_v4, 0.0 }
  0xf0   : > { %v725_v63 = vadd.f32 %v724_v60, %v723_v56  ;;  %v624_v0 = vadd.f32 %v623_v61, %v622_v55  ;;  %v982_v1 = vpop.f32.mrf.mxu0  ;;  %v1217_v2 = vpop.f32.mrf.mxu1 }
  0xf1   : > { %v726_v5 = vsel %vm581_vm2, %v690_v62, 0.0  ;;  %592 = vst.msk [vmem:[%s1148_s9 + $0x50] sm:$0xff] %vm581_vm2, %v982_v1  ;;  %608 = vst.msk [vmem:[%s1148_s9 + $0xd0] sm:$0xff] %vm581_vm2, %v1217_v2  ;;  %v695_v24 = vmul.f32 %v982_v1, %v982_v1  ;;  %v633_v35 = vsel %vm581_vm2, %v982_v1, 0.0 }
  0xf2   : > { %v626_v6 = vadd.f32 %v625_v3, %v624_v0  ;;  %v727_v7 = vadd.f32 %v726_v5, %v725_v63  ;;  %v486_v8 = vpop.f32.mrf.mxu0  ;;  %v1226_v9 = vpop.f32.mrf.mxu1 }
  0xf3   : > { %590 = vst.msk [vmem:[%s1148_s9 + $0x40] sm:$0xff] %vm581_vm2, %v486_v8  ;;  %v693_v12 = vmul.f32 %v486_v8, %v486_v8  ;;  %606 = vst.msk [vmem:[%s1148_s9 + $0xc0] sm:$0xff] %vm581_vm2, %v1226_v9  ;;  %v629_v18 = vsel %vm581_vm2, %v486_v8, 0.0  ;;  %v736_v43 = vsel %vm581_vm2, %v695_v24, 0.0 }
  0xf4   : > { %v729_v13 = vadd.f32 %v728_v10, %v727_v7  ;;  %v628_v14 = vadd.f32 %v627_v11, %v626_v6  ;;  %v983_v15 = vpop.f32.mrf.mxu0  ;;  %v1235_v16 = vpop.f32.mrf.mxu1  ;;  %v701_v10 = vmul.f32 %v1157_v25, %v1157_v25 }
  0xf5   : > { %593 = vst.msk [vmem:[%s1148_s9 + $0x58] sm:$0xff] %vm581_vm2, %v983_v15  ;;  %609 = vst.msk [vmem:[%s1148_s9 + $0xd8] sm:$0xff] %vm581_vm2, %v1235_v16  ;;  %v732_v26 = vsel %vm581_vm2, %v693_v12, 0.0  ;;  %v696_v36 = vmul.f32 %v983_v15, %v983_v15  ;;  %v635_v44 = vsel %vm581_vm2, %v983_v15, 0.0  ;;  %v702_v15 = vmul.f32 %v1171_v30, %v1171_v30 }
  0xf6   : > { %v630_v19 = vadd.f32 %v629_v18, %v628_v14  ;;  %v731_v20 = vadd.f32 %v730_v17, %v729_v13  ;;  %v489_v21 = vpop.f32.mrf.mxu0  ;;  %v1244_v22 = vpop.f32.mrf.mxu1  ;;  %v645_v14 = vsel %vm581_vm2, %v1157_v25, 0.0  ;;  %v704_v25 = vmul.f32 %v1164_v27, %v1164_v27 }
  0xf7   : > { %591 = vst.msk [vmem:[%s1148_s9 + $0x48] sm:$0xff] %vm581_vm2, %v489_v21  ;;  %v631_v28 = vsel %vm581_vm2, %v489_v21, 0.0  ;;  %v694_v29 = vmul.f32 %v489_v21, %v489_v21  ;;  %607 = vst.msk [vmem:[%s1148_s9 + $0xc8] sm:$0xff] %vm581_vm2, %v1244_v22  ;;  %v738_v51 = vsel %vm581_vm2, %v696_v36, 0.0  ;;  %v647_v21 = vsel %vm581_vm2, %v1171_v30, 0.0 }
  0xf8   : > { %v733_v31 = vadd.f32 %v732_v26, %v731_v20  ;;  %v632_v32 = vadd.f32 %v631_v28, %v630_v19  ;;  %v986_v33 = vpop.f32.mrf.mxu0  ;;  %v1253_v34 = vpop.f32.mrf.mxu1  ;;  %v703_v19 = vmul.f32 %v1150_v23, %v1150_v23  ;;  %v748_v20 = vsel %vm581_vm2, %v701_v10, 0.0 }
  0xf9   : > { %v734_v38 = vsel %vm581_vm2, %v694_v29, 0.0  ;;  %596 = vst.msk [vmem:[%s1148_s9 + $0x70] sm:$0xff] %vm581_vm2, %v986_v33  ;;  %612 = vst.msk [vmem:[%s1148_s9 + $0xf0] sm:$0xff] %vm581_vm2, %v1253_v34  ;;  %v699_v59 = vmul.f32 %v986_v33, %v986_v33  ;;  %v641_v1 = vsel %vm581_vm2, %v986_v33, 0.0  ;;  %v649_v28 = vsel %vm581_vm2, %v1150_v23, 0.0 }
  0xfa   : > { %v634_v39 = vadd.f32 %v633_v35, %v632_v32  ;;  %v735_v40 = vadd.f32 %v734_v38, %v733_v31  ;;  %v502_v41 = vpop.f32.mrf.mxu0  ;;  %v1262_v42 = vpop.f32.mrf.mxu1  ;;  %v750_v29 = vsel %vm581_vm2, %v702_v15, 0.0  ;;  %v752_v33 = vsel %vm581_vm2, %v703_v19, 0.0 }
  0xfb   : > { %594 = vst.msk [vmem:[%s1148_s9 + $0x60] sm:$0xff] %vm581_vm2, %v502_v41  ;;  %v697_v46 = vmul.f32 %v502_v41, %v502_v41  ;;  %610 = vst.msk [vmem:[%s1148_s9 + $0xe0] sm:$0xff] %vm581_vm2, %v1262_v42  ;;  %v637_v53 = vsel %vm581_vm2, %v502_v41, 0.0  ;;  %v744_v7 = vsel %vm581_vm2, %v699_v59, 0.0  ;;  %v651_v35 = vsel %vm581_vm2, %v1164_v27, 0.0 }
  0xfc   : > { %v737_v47 = vadd.f32 %v736_v43, %v735_v40  ;;  %v636_v48 = vadd.f32 %v635_v44, %v634_v39  ;;  %v987_v49 = vpop.f32.mrf.mxu0  ;;  %v1271_v50 = vpop.f32.mrf.mxu1  ;;  %v705_v30 = vmul.f32 %v1190_v45, %v1190_v45  ;;  %v754_v39 = vsel %vm581_vm2, %v704_v25, 0.0 }
  0xfd   : > { %597 = vst.msk [vmem:[%s1148_s9 + $0x78] sm:$0xff] %vm581_vm2, %v987_v49  ;;  %613 = vst.msk [vmem:[%s1148_s9 + $0xf8] sm:$0xff] %vm581_vm2, %v1271_v50  ;;  %v740_v60 = vsel %vm581_vm2, %v697_v46, 0.0  ;;  %v700_v3 = vmul.f32 %v987_v49, %v987_v49  ;;  %v643_v8 = vsel %vm581_vm2, %v987_v49, 0.0  ;;  %v653_v23 = vsel %vm581_vm2, %v1190_v45, 0.0 }
  0xfe   : > { %v638_v54 = vadd.f32 %v637_v53, %v636_v48  ;;  %v739_v55 = vadd.f32 %v738_v51, %v737_v47  ;;  %v505_v56 = vpop.f32.mrf.mxu0  ;;  %v1280_v57 = vpop.f32.mrf.mxu1  ;;  %v706_v40 = vmul.f32 %v1208_v58, %v1208_v58  ;;  %v707_v44 = vmul.f32 %v1180_v37, %v1180_v37 }
  0xff   : > { %595 = vst.msk [vmem:[%s1148_s9 + $0x68] sm:$0xff] %vm581_vm2, %v505_v56  ;;  %v639_v61 = vsel %vm581_vm2, %v505_v56, 0.0  ;;  %v698_v62 = vmul.f32 %v505_v56, %v505_v56  ;;  %611 = vst.msk [vmem:[%s1148_s9 + $0xe8] sm:$0xff] %vm581_vm2, %v1280_v57  ;;  %v746_v13 = vsel %vm581_vm2, %v700_v3, 0.0  ;;  %v756_v27 = vsel %vm581_vm2, %v705_v30, 0.0 }
 0x100   : > { %v741_v63 = vadd.f32 %v740_v60, %v739_v55  ;;  %v640_v0 = vadd.f32 %v639_v61, %v638_v54  ;;  %v655_v46 = vsel %vm581_vm2, %v1208_v58, 0.0  ;;  %v657_v49 = vsel %vm581_vm2, %v1180_v37, 0.0 }
 0x101   : > { %v742_v4 = vsel %vm581_vm2, %v698_v62, 0.0  ;;  %v708_v45 = vmul.f32 %v1199_v52, %v1199_v52  ;;  %v758_v51 = vsel %vm581_vm2, %v706_v40, 0.0  ;;  %v760_v55 = vsel %vm581_vm2, %v707_v44, 0.0 }
 0x102   : > { %v642_v5 = vadd.f32 %v641_v1, %v640_v0  ;;  %v743_v6 = vadd.f32 %v742_v4, %v741_v63  ;;  %v659_v56 = vsel %vm581_vm2, %v1199_v52, 0.0  ;;  %v709_v58 = vmul.f32 %v1226_v9, %v1226_v9 }
 0x103   : > { %v762_v61 = vsel %vm581_vm2, %v708_v45, 0.0  ;;  %v661_v37 = vsel %vm581_vm2, %v1226_v9, 0.0  ;;  %v710_v62 = vmul.f32 %v1244_v22, %v1244_v22  ;;  %v711_v1 = vmul.f32 %v1217_v2, %v1217_v2 }
 0x104   : > { %v644_v11 = vadd.f32 %v643_v8, %v642_v5  ;;  %v745_v12 = vadd.f32 %v744_v7, %v743_v6  ;;  %v764_v52 = vsel %vm581_vm2, %v709_v58, 0.0  ;;  %v663_v3 = vsel %vm581_vm2, %v1244_v22, 0.0 }
 0x105   : > { %v665_v6 = vsel %vm581_vm2, %v1217_v2, 0.0  ;;  %v712_v9 = vmul.f32 %v1235_v16, %v1235_v16  ;;  %v766_v7 = vsel %vm581_vm2, %v710_v62, 0.0  ;;  %v713_v22 = vmul.f32 %v1262_v42, %v1262_v42 }
 0x106   : > { %v747_v17 = vadd.f32 %v746_v13, %v745_v12  ;;  %v646_v18 = vadd.f32 %v645_v14, %v644_v11  ;;  %v768_v11 = vsel %vm581_vm2, %v711_v1, 0.0  ;;  %v667_v12 = vsel %vm581_vm2, %v1235_v16, 0.0 }
 0x107   : > { %v770_v15 = vsel %vm581_vm2, %v712_v9, 0.0  ;;  %v669_v2 = vsel %vm581_vm2, %v1262_v42, 0.0  ;;  %v772_v16 = vsel %vm581_vm2, %v713_v22, 0.0  ;;  %v716_v42 = vmul.f32 %v1271_v50, %v1271_v50 }
 0x108   : > { %v648_v24 = vadd.f32 %v647_v21, %v646_v18  ;;  %v749_v26 = vadd.f32 %v748_v20, %v747_v17  ;;  %v714_v17 = vmul.f32 %v1280_v57, %v1280_v57  ;;  %v715_v20 = vmul.f32 %v1253_v34, %v1253_v34 }
 0x109   : > { %v671_v21 = vsel %vm581_vm2, %v1280_v57, 0.0  ;;  %v778_v30 = vsel %vm581_vm2, %v716_v42, 0.0 }
 0x10a   : > { %v650_v31 = vadd.f32 %v649_v28, %v648_v24  ;;  %v751_v32 = vadd.f32 %v750_v29, %v749_v26  ;;  %v673_v28 = vsel %vm581_vm2, %v1253_v34, 0.0  ;;  %v774_v25 = vsel %vm581_vm2, %v714_v17, 0.0 }
 0x10c   : > { %v753_v36 = vadd.f32 %v752_v33, %v751_v32  ;;  %v652_v38 = vadd.f32 %v651_v35, %v650_v31  ;;  %v776_v32 = vsel %vm581_vm2, %v715_v20, 0.0  ;;  %v675_v33 = vsel %vm581_vm2, %v1271_v50, 0.0 }
 0x10e   : > { %v654_v41 = vadd.f32 %v653_v23, %v652_v38  ;;  %v755_v43 = vadd.f32 %v754_v39, %v753_v36 }
 0x110   : > { %v757_v47 = vadd.f32 %v756_v27, %v755_v43  ;;  %v656_v48 = vadd.f32 %v655_v46, %v654_v41 }
 0x112   : > { %v658_v53 = vadd.f32 %v657_v49, %v656_v48  ;;  %v759_v54 = vadd.f32 %v758_v51, %v757_v47 }
 0x114   : > { %v761_v59 = vadd.f32 %v760_v55, %v759_v54  ;;  %v660_v60 = vadd.f32 %v659_v56, %v658_v53 }
 0x116   : > { %v662_v63 = vadd.f32 %v661_v37, %v660_v60  ;;  %v763_v0 = vadd.f32 %v762_v61, %v761_v59 }
 0x118   : > { %v765_v4 = vadd.f32 %v764_v52, %v763_v0  ;;  %v664_v5 = vadd.f32 %v663_v3, %v662_v63 }
 0x11a   : > { %v666_v8 = vadd.f32 %v665_v6, %v664_v5  ;;  %v767_v10 = vadd.f32 %v766_v7, %v765_v4 }
 0x11c   : > { %v769_v13 = vadd.f32 %v768_v11, %v767_v10  ;;  %v668_v14 = vadd.f32 %v667_v12, %v666_v8 }
 0x11e   : > { %v670_v18 = vadd.f32 %v669_v2, %v668_v14  ;;  %v771_v19 = vadd.f32 %v770_v15, %v769_v13 }
 0x120   : > { %v773_v24 = vadd.f32 %v772_v16, %v771_v19  ;;  %v672_v26 = vadd.f32 %v671_v21, %v670_v18 }
 0x122   : > { %v674_v29 = vadd.f32 %v673_v28, %v672_v26  ;;  %v775_v31 = vadd.f32 %v774_v25, %v773_v24 }
 0x124   : > { %v676_v35 = vadd.f32 %v675_v33, %v674_v29  ;;  %v777_v57 = vadd.f32 %v776_v32, %v775_v31 }
 0x126   : > { %v677_v36 = vrot.slane %v676_v35, 4  ;;  %v779_v38 = vadd.f32 %v778_v30, %v777_v57 }
 0x128   : > { %v678_v34 = vadd.f32 %v677_v36, %v676_v35  ;;  %v780_v39 = vrot.slane %v779_v38, 4 }
 0x12a   : > { %v679_v23 = vrot.slane %v678_v34, 2  ;;  %v781_v40 = vadd.f32 %v780_v39, %v779_v38 }
 0x12c   : > { %v680_v41 = vadd.f32 %v679_v23, %v678_v34  ;;  %v782_v43 = vrot.slane %v781_v40, 2 }
 0x12e   : > { %v681_v44 = vrot.slane %v680_v41, 1  ;;  %v783_v27 = vadd.f32 %v782_v43, %v781_v40 }
 0x130   : > { %v682_v50 = vadd.f32 %v681_v44, %v680_v41  ;;  %v784_v46 = vrot.slane %v783_v27, 1 }
 0x132   : > { %684 = vst.msk [vmem:[%s214_s12] sm:$0x1] %vm683_vm3, %v682_v50  ;;  %v785_v47 = vadd.f32 %v784_v46, %v783_v27 }
 0x134   : > { %786 = vst.msk [vmem:[%s217_s17] sm:$0x1] %vm683_vm3, %v785_v47 }
 0x135 PF: > { %s15_s15 = sadd.s32 1, %s1051_s15  }
 0x136   : > { %p12_p5 = scmp.ge.s32.totalorder %s15_s15, 4  }
 0x138   :  { %14 = sbr.rel (!%p12_p5) target bundleno = 1 (0x1), region = 82 }

</bundles_post_ra>
